<compile_context>
chip_gen: v7x
topology: tpu7x:2x2x1
jax: 0.10.0
libtpu: 0.0.40
codegen_flags: <defaults>
</compile_context>

<pallas_src>
import functools

import jax
import jax.numpy as jnp
import numpy as np
from jax.experimental import pallas as pl
from jax.experimental.pallas import tpu as pltpu

_PAD = 128   # lane padding for hidden / output dims (must cover H, F, 2S, state_dim)


# --------------------------------------------------------------------------- #
# One-time parameter packing (hoisted out of the per-call hot path).
# --------------------------------------------------------------------------- #
def _pad2(x, rows, cols):
  """Zero-pad the last two dims of x up to (rows, cols)."""
  pads = [(0, 0)] * (x.ndim - 2) + [(0, rows - x.shape[-2]), (0, cols - x.shape[-1])]
  return jnp.pad(x, pads)


def pack_params(params, pad=_PAD):
  """Pack + pad weights once; returns lane-dense slabs to feed the jitted step.

  Applies the (get_force layer 3) . (apply_force layer-1 force half) fusion:
      Wcomb[a, c] = wg3[a, c] @ wa1[c, :F, :]              (H, H)
      bfold[c]    = (sum_a bg3[a, c]) @ wa1[c, :F, :]      (1, H)  (scaled by N in-kernel)
  so the F-dim force never materializes and wg3 / wa1-force-half never reach the kernel.

  Slab row layouts (width P = 128):
      gf: (C, C, 2P+2S+2, P) rows = [wg2 | Wcomb | wg1(=[Wv;Wr]) | bg1 | bg2]
      af: (C,    2P+S +4, P) rows = [wa2 | wa3 | wa1_pos | ba1 | ba2 | ba3 | bfold]
  """
  C = params["wg1"].shape[0]
  S = params["wg1"].shape[2] // 2
  H = params["wg1"].shape[3]
  F = params["wg3"].shape[-1]
  S_out = params["wa3"].shape[-1]
  P = pad
  assert max(H, F, S_out, 2 * S) <= P, "pad width must cover hidden/force/output dims"

  wa1f = params["wa1"][:, :F, :]                         # (C, F, H) force half
  wa1x = params["wa1"][:, F:, :]                         # (C, S, H) position half

  wcomb = jnp.einsum("achf,cfk->achk", params["wg3"], wa1f)            # (C, C, H, H)
  bfold = jnp.einsum("cf,cfk->ck",
                     params["bg3"][:, :, 0, :].sum(axis=0), wa1f)      # (C, H)

  gf = jnp.concatenate([
      _pad2(params["wg2"], P, P),          # rows [0, P)
      _pad2(wcomb, P, P),                  # rows [P, 2P)
      _pad2(params["wg1"], 2 * S, P),      # rows [2P, 2P+2S)  = [Wv; Wr]
      _pad2(params["bg1"], 1, P),          # row 2P+2S
      _pad2(params["bg2"], 1, P),          # row 2P+2S+1
  ], axis=-2)                               # (C, C, 2P+2S+2, P)

  af = jnp.concatenate([
      _pad2(params["wa2"], P, P),          # rows [0, P)
      _pad2(params["wa3"], P, P),          # rows [P, 2P)
      _pad2(wa1x, S, P),                   # rows [2P, 2P+S)
      _pad2(params["ba1"], 1, P),          # row 2P+S
      _pad2(params["ba2"], 1, P),          # row 2P+S+1
      _pad2(params["ba3"], 1, P),          # row 2P+S+2
      _pad2(bfold[:, None, :], 1, P),      # row 2P+S+3
  ], axis=-2)                               # (C, 2P+S+4, P)

  return {"gf": gf, "af": af, "s_out": int(S_out)}


# --------------------------------------------------------------------------- #
# Kernel
# --------------------------------------------------------------------------- #
def _make_kernel(C, N, S, P, cps, single_step):
  S2 = 2 * S
  # get_force slab row offsets
  W1_OFF = 2 * P
  WR_OFF = W1_OFF + S
  B1_OFF = W1_OFF + S2
  B2_OFF = B1_OFF + 1
  # apply_force slab row offsets
  WA1X_OFF = 2 * P
  BA1_OFF = WA1X_OFF + S
  BA2_OFF = BA1_OFF + 1
  BA3_OFF = BA2_OFF + 1
  BF_OFF = BA3_OFF + 1
  # Bound the quadratic (N, JC, P) intermediate as N grows (v7x: 64 MiB VMEM).
  JC = min(N, 128)

  def kernel(state_ref, gf_ref, af_ref, out_ref):
    for cc in range(cps):                        # local actee classes in this grid step
      c_glob = cc if single_step else pl.program_id(0) * cps + cc
      actee_st = state_ref[c_glob]               # (N, 3S) = [obj | vel | -obj]
      actee = actee_st[:, :S]                    # (N, S)

      # Accumulates force @ Wa1_force directly (fused), in the padded H lane space.
      h_pre = jnp.zeros((N, P), jnp.float32)

      for a in range(C):                         # actor classes: static, fully unrolled
        xa = state_ref[a][:, S:3 * S]            # (N, 2S) = [vel, -actor]
        g = gf_ref.at[a, cc]                     # (Rg, P) slab view for (actor, actee)

        w1 = g[W1_OFF:W1_OFF + S2, :]            # (2S, P) = [Wv; Wr]
        wr = g[WR_OFF:WR_OFF + S, :]             # (S, P)
        b1 = g[B1_OFF:B1_OFF + 1, :]
        b2 = g[B2_OFF:B2_OFF + 1, :]

        # get_force layer 1 via linearity — one actor-side matmul:
        #   pre[i, j] = [vel_j, -actor_j] @ [Wv; Wr] + actee_i @ Wr + b1
        t_actor = jnp.dot(xa, w1, preferred_element_type=jnp.float32) + b1   # (N, P)
        t_actee = jnp.dot(actee, wr, preferred_element_type=jnp.float32)     # (N, P)

        # get_force layer 2, chunked over the actor-object axis (1 chunk at N=8).
        h_sum = jnp.zeros((N, P), jnp.float32)
        for j0 in range(0, N, JC):
          jc = min(JC, N - j0)
          h1 = jnp.maximum(t_actee[:, None, :] + t_actor[None, j0:j0 + jc, :], 0.0)
          h2 = jnp.maximum(
              jnp.dot(h1.reshape(N * jc, P), g[0:P, :],
                      preferred_element_type=jnp.float32) + b2, 0.0)
          h_sum = h_sum + h2.reshape(N, jc, P).sum(axis=1)

        # Fused (get_force layer 3) . (apply_force layer-1 force half): Wcomb rows.
        h_pre = h_pre + jnp.dot(h_sum, g[P:2 * P, :],
                                preferred_element_type=jnp.float32)

      aw = af_ref.at[cc]                         # (Ra, P) slab view for this actee
      wa1x = aw[WA1X_OFF:WA1X_OFF + S, :]
      ba1 = aw[BA1_OFF:BA1_OFF + 1, :]
      ba2 = aw[BA2_OFF:BA2_OFF + 1, :]
      ba3 = aw[BA3_OFF:BA3_OFF + 1, :]
      bfold = aw[BF_OFF:BF_OFF + 1, :]           # (sum_a bg3) @ Wa1_force; scale by N

      h = jnp.maximum(
          h_pre + jnp.dot(actee, wa1x, preferred_element_type=jnp.float32)
          + ba1 + jnp.float32(N) * bfold, 0.0)
      h = jnp.maximum(
          jnp.dot(h, aw[0:P, :], preferred_element_type=jnp.float32) + ba2, 0.0)
      out_ref[cc] = (jnp.dot(h, aw[P:2 * P, :], preferred_element_type=jnp.float32)
                     + ba3).astype(out_ref.dtype)

  return kernel


def _single_tensorcore_chip():
  """True on single-TensorCore chips (v5e / v6e) -> collapse the grid to one step."""
  try:
    kind = jax.devices()[0].device_kind.lower()
  except Exception:
    return False
  return any(t in kind for t in ("v5e", "v5 lite", "v5lite", "v6e", "v6 lite", "v6lite"))


@functools.partial(jax.jit, static_argnames=("s_out",))
def pairwise_interact(obj_locs, prev_obj_locs, gf, af, *, s_out):
  """Forward pass. obj_locs / prev_obj_locs: (C, N, S); gf / af from pack_params()."""
  C, N, S = obj_locs.shape
  P = gf.shape[-1]
  Rg, Ra = gf.shape[-2], af.shape[-2]
  assert Rg == 2 * P + 2 * S + 2 and Ra == 2 * P + S + 4, "slab layout mismatch"

  # Single state stream [obj | vel | -obj] (drops the separate prev_obj_locs stream).
  state = jnp.concatenate(
      [obj_locs, obj_locs - prev_obj_locs, -obj_locs], axis=-1)        # (C, N, 3S)

  # v5e/v6e have one TensorCore, so a (C,) grid is just a serial loop with per-step
  # overhead: collapse it and loop actee classes in-body.  v7x has 2 TCs: keep one
  # actee class per grid step so each core takes one.
  cps = C if _single_tensorcore_chip() else 1        # actee classes per grid step
  G = C // cps

  out = pl.pallas_call(
      _make_kernel(C, N, S, P, cps, single_step=(G == 1)),
      out_shape=jax.ShapeDtypeStruct((C, N, P), jnp.float32),
      grid=(G,),
      in_specs=[
          pl.BlockSpec((C, N, 3 * S), lambda g: (0, 0, 0)),       # all classes' state
          pl.BlockSpec((C, cps, Rg, P), lambda g: (0, g, 0, 0)),   # get_force slab
          pl.BlockSpec((cps, Ra, P), lambda g: (g, 0, 0)),         # apply_force slab
      ],
      out_specs=pl.BlockSpec((cps, N, P), lambda g: (g, 0, 0)),
      compiler_params=pltpu.CompilerParams(
          # TODO(synk): on v7x, if a profile shows one TensorCore idle, switch this
          # axis to pltpu.CORE_PARALLEL (or core_map) to force 2-way core sharding.
          dimension_semantics=("parallel",)),
  )(state, gf, af)

  return out[:, :, :s_out]            # strip lane padding -> (C, N, state_dim)


# --------------------------------------------------------------------------- #
# Synthetic params + pure-JAX reference (mirrors the PyTorch module).
# --------------------------------------------------------------------------- #
def init_params(key, C=2, S=2, F=2, H=100):
  """Deterministic synthetic params. Weights stored as (in, out); biases as (..., 1, out)."""
  ks = jax.random.split(key, 12)
  def w(k, shape, fan_in):
    return jax.random.normal(k, shape, jnp.float32) / np.sqrt(fan_in).astype(np.float32)
  return {
      # get_force MLP params, stacked over (actor, actee): layer_sizes [2S, H, H, F]
      "wg1": w(ks[0], (C, C, 2 * S, H), 2 * S),
      "bg1": w(ks[1], (C, C, 1, H), 2 * S),
      "wg2": w(ks[2], (C, C, H, H), H),
      "bg2": w(ks[3], (C, C, 1, H), H),
      "wg3": w(ks[4], (C, C, H, F), H),
      "bg3": w(ks[5], (C, C, 1, F), H),
      # apply_force MLP params, stacked over actee: layer_sizes [F+S, H, H, S]
      "wa1": w(ks[6], (C, F + S, H), F + S),
      "ba1": w(ks[7], (C, 1, H), F + S),
      "wa2": w(ks[8], (C, H, H), H),
      "ba2": w(ks[9], (C, 1, H), H),
      "wa3": w(ks[10], (C, H, S), H),
      "ba3": w(ks[11], (C, 1, S), H),
  }


def reference(obj_locs, prev_obj_locs, params):
  """Pure-JAX replica of PairwiseInteract.forward for verification."""
  C, N, S = obj_locs.shape
  F = params["wg3"].shape[-1]
  preds = []
  for c in range(C):
    force = jnp.zeros((N, F), jnp.float32)
    for a in range(C):
      vel = obj_locs[a] - prev_obj_locs[a]                        # (N, S)
      rel = obj_locs[c][:, None, :] - obj_locs[a][None, :, :]     # (N, N, S)
      x = jnp.concatenate(
          [jnp.broadcast_to(vel[None], (N, N, S)), rel], -1).reshape(N * N, 2 * S)
      h = jax.nn.relu(x @ params["wg1"][a, c] + params["bg1"][a, c, 0])
      h = jax.nn.relu(h @ params["wg2"][a, c] + params["bg2"][a, c, 0])
      f = h @ params["wg3"][a, c] + params["bg3"][a, c, 0]
      force = force + f.reshape(N, N, F).sum(axis=1)
    inp = jnp.concatenate([force, obj_locs[c]], axis=1)
    h = jax.nn.relu(inp @ params["wa1"][c] + params["ba1"][c, 0])
    h = jax.nn.relu(h @ params["wa2"][c] + params["ba2"][c, 0])
    preds.append(h @ params["wa3"][c] + params["ba3"][c, 0])
  return jnp.stack(preds)


if __name__ == "__main__":
  C, N, S, F, H = 2, 8, 2, 2, 100   # n_classes, objects/class, state_dim, force_dim, hidden

  key = jax.random.PRNGKey(0)
  k_obj, k_prev, k_par = jax.random.split(key, 3)
  obj_locs = jax.random.normal(k_obj, (C, N, S), jnp.float32)
  prev_obj_locs = obj_locs + 0.1 * jax.random.normal(k_prev, (C, N, S), jnp.float32)
  params = init_params(k_par, C=C, S=S, F=F, H=H)

  packed = pack_params(params)      # one-time packing/padding, hoisted out of the step

  preds = pairwise_interact(obj_locs, prev_obj_locs, packed["gf"], packed["af"],
                            s_out=packed["s_out"])
  preds = jax.block_until_ready(preds)

  ref = jax.block_until_ready(reference(obj_locs, prev_obj_locs, params))
  if not np.allclose(np.asarray(preds), np.asarray(ref), rtol=1e-3, atol=1e-3):
    raise AssertionError("Pallas kernel does not match pure-JAX reference")

  print("KERNEL_OK")
</pallas_src>

<mosaic_0001>
module attributes {stable_mosaic.version = 11 : i64} {
  func.func @kernel(%arg0: i32, %arg1: memref<2x8x6xf32, #tpu.memory_space<vmem>>, %arg2: memref<2x1x262x128xf32, #tpu.memory_space<vmem>>, %arg3: memref<1x262x128xf32, #tpu.memory_space<vmem>>, %arg4: memref<1x8x128xf32, #tpu.memory_space<vmem>>) attributes {dimension_semantics = [#tpu.dimension_semantics<parallel>], iteration_bounds = array<i64: 2>, scalar_prefetch = 0 : i64, scratch_operands = 0 : i64, tpu.core_type = #tpu.core_type<tc>, window_params = [{pipeline_mode = #tpu.pipeline_mode<synchronous>, transform_indices = @transform_0, window_bounds = array<i64: 2, 8, 6>}, {transform_indices = @transform_1, window_bounds = array<i64: 2, 1, 262, 128>}, {transform_indices = @transform_2, window_bounds = array<i64: 1, 262, 128>}, {transform_indices = @transform_3, window_bounds = array<i64: 1, 8, 128>}]} {
    %c1_i32 = arith.constant 1 : i32
    %0 = arith.muli %arg0, %c1_i32 : i32
    %c0_i32 = arith.constant 0 : i32
    %1 = arith.addi %0, %c0_i32 : i32
    %2 = arith.index_cast %1 : i32 to index
    %c0 = arith.constant 0 : index
    %c0_0 = arith.constant 0 : index
    %3 = vector.load %arg1[%2, %c0, %c0_0] : memref<2x8x6xf32, #tpu.memory_space<vmem>>, vector<1x8x6xf32>
    %4 = vector.shape_cast %3 : vector<1x8x6xf32> to vector<8x6xf32>
    %5 = vector.extract_strided_slice %4 {offsets = [0, 0], sizes = [8, 2], strides = [1, 1]} : vector<8x6xf32> to vector<8x2xf32>
    %cst = arith.constant 0.000000e+00 : f32
    %6 = vector.broadcast %cst : f32 to vector<8x128xf32>
    %c0_1 = arith.constant 0 : index
    %c0_2 = arith.constant 0 : index
    %c0_3 = arith.constant 0 : index
    %7 = vector.load %arg1[%c0_1, %c0_2, %c0_3] : memref<2x8x6xf32, #tpu.memory_space<vmem>>, vector<1x8x6xf32>
    %8 = vector.shape_cast %7 : vector<1x8x6xf32> to vector<8x6xf32>
    %9 = vector.extract_strided_slice %8 {offsets = [0, 2], sizes = [8, 4], strides = [1, 1]} : vector<8x6xf32> to vector<8x4xf32>
    %c0_i32_4 = arith.constant 0 : i32
    %c0_i32_5 = arith.constant 0 : i32
    %c0_i32_6 = arith.constant 0 : i32
    %c0_i32_7 = arith.constant 0 : i32
    %10 = tpu.memref_slice %arg2[%c0_i32_4, %c0_i32_5, %c0_i32_6, %c0_i32_7] : memref<2x1x262x128xf32, #tpu.memory_space<vmem>> -> memref<1x1x262x128xf32, #tpu.memory_space<vmem>>
    %11 = tpu.memref_squeeze %10 : memref<1x1x262x128xf32, #tpu.memory_space<vmem>> -> memref<262x128xf32, #tpu.memory_space<vmem>>
    %c256 = arith.constant 256 : index
    %c0_8 = arith.constant 0 : index
    %12 = vector.load %11[%c256, %c0_8] : memref<262x128xf32, #tpu.memory_space<vmem>>, vector<4x128xf32>
    %c0_i32_9 = arith.constant 0 : i32
    %c0_i32_10 = arith.constant 0 : i32
    %c0_i32_11 = arith.constant 0 : i32
    %c0_i32_12 = arith.constant 0 : i32
    %13 = tpu.memref_slice %arg2[%c0_i32_9, %c0_i32_10, %c0_i32_11, %c0_i32_12] : memref<2x1x262x128xf32, #tpu.memory_space<vmem>> -> memref<1x1x262x128xf32, #tpu.memory_space<vmem>>
    %14 = tpu.memref_squeeze %13 : memref<1x1x262x128xf32, #tpu.memory_space<vmem>> -> memref<262x128xf32, #tpu.memory_space<vmem>>
    %c258 = arith.constant 258 : index
    %c0_13 = arith.constant 0 : index
    %15 = vector.load %14[%c258, %c0_13] : memref<262x128xf32, #tpu.memory_space<vmem>>, vector<2x128xf32>
    %c0_i32_14 = arith.constant 0 : i32
    %c0_i32_15 = arith.constant 0 : i32
    %c0_i32_16 = arith.constant 0 : i32
    %c0_i32_17 = arith.constant 0 : i32
    %16 = tpu.memref_slice %arg2[%c0_i32_14, %c0_i32_15, %c0_i32_16, %c0_i32_17] : memref<2x1x262x128xf32, #tpu.memory_space<vmem>> -> memref<1x1x262x128xf32, #tpu.memory_space<vmem>>
    %17 = tpu.memref_squeeze %16 : memref<1x1x262x128xf32, #tpu.memory_space<vmem>> -> memref<262x128xf32, #tpu.memory_space<vmem>>
    %c260 = arith.constant 260 : index
    %c0_18 = arith.constant 0 : index
    %18 = vector.load %17[%c260, %c0_18] : memref<262x128xf32, #tpu.memory_space<vmem>>, vector<1x128xf32>
    %c0_i32_19 = arith.constant 0 : i32
    %c0_i32_20 = arith.constant 0 : i32
    %c0_i32_21 = arith.constant 0 : i32
    %c0_i32_22 = arith.constant 0 : i32
    %19 = tpu.memref_slice %arg2[%c0_i32_19, %c0_i32_20, %c0_i32_21, %c0_i32_22] : memref<2x1x262x128xf32, #tpu.memory_space<vmem>> -> memref<1x1x262x128xf32, #tpu.memory_space<vmem>>
    %20 = tpu.memref_squeeze %19 : memref<1x1x262x128xf32, #tpu.memory_space<vmem>> -> memref<262x128xf32, #tpu.memory_space<vmem>>
    %c261 = arith.constant 261 : index
    %c0_23 = arith.constant 0 : index
    %21 = vector.load %20[%c261, %c0_23] : memref<262x128xf32, #tpu.memory_space<vmem>>, vector<1x128xf32>
    %cst_24 = arith.constant dense<0.000000e+00> : vector<8x128xf32>
    %22 = tpu.matmul %9, %12, %cst_24 {dimension_numbers = #tpu.dot_dimension_numbers<[1], [0], [0], [1], [0, 0, 1, 1], [], []>} : vector<8x4xf32>, vector<4x128xf32>, vector<8x128xf32> -> vector<8x128xf32>
    %23 = vector.broadcast %18 : vector<1x128xf32> to vector<8x128xf32>
    %24 = arith.addf %22, %23 : vector<8x128xf32>
    %cst_25 = arith.constant dense<0.000000e+00> : vector<8x128xf32>
    %25 = tpu.matmul %5, %15, %cst_25 {dimension_numbers = #tpu.dot_dimension_numbers<[1], [0], [0], [1], [0, 0, 1, 1], [], []>} : vector<8x2xf32>, vector<2x128xf32>, vector<8x128xf32> -> vector<8x128xf32>
    %cst_26 = arith.constant 0.000000e+00 : f32
    %26 = vector.broadcast %cst_26 : f32 to vector<8x128xf32>
    %27 = vector.shape_cast %25 : vector<8x128xf32> to vector<8x1x128xf32>
    %28 = vector.shape_cast %24 : vector<8x128xf32> to vector<1x8x128xf32>
    %29 = vector.broadcast %27 : vector<8x1x128xf32> to vector<8x8x128xf32>
    %30 = vector.broadcast %28 : vector<1x8x128xf32> to vector<8x8x128xf32>
    %31 = arith.addf %29, %30 : vector<8x8x128xf32>
    %cst_27 = arith.constant 0.000000e+00 : f32
    %32 = vector.broadcast %cst_27 : f32 to vector<8x8x128xf32>
    %33 = arith.maximumf %31, %32 : vector<8x8x128xf32>
    %34 = vector.shape_cast %33 : vector<8x8x128xf32> to vector<64x128xf32>
    %c0_i32_28 = arith.constant 0 : i32
    %c0_i32_29 = arith.constant 0 : i32
    %c0_i32_30 = arith.constant 0 : i32
    %c0_i32_31 = arith.constant 0 : i32
    %35 = tpu.memref_slice %arg2[%c0_i32_28, %c0_i32_29, %c0_i32_30, %c0_i32_31] : memref<2x1x262x128xf32, #tpu.memory_space<vmem>> -> memref<1x1x262x128xf32, #tpu.memory_space<vmem>>
    %36 = tpu.memref_squeeze %35 : memref<1x1x262x128xf32, #tpu.memory_space<vmem>> -> memref<262x128xf32, #tpu.memory_space<vmem>>
    %c0_32 = arith.constant 0 : index
    %c0_33 = arith.constant 0 : index
    %37 = vector.load %36[%c0_32, %c0_33] : memref<262x128xf32, #tpu.memory_space<vmem>>, vector<128x128xf32>
    %cst_34 = arith.constant dense<0.000000e+00> : vector<64x128xf32>
    %38 = tpu.matmul %34, %37, %cst_34 {dimension_numbers = #tpu.dot_dimension_numbers<[1], [0], [0], [1], [0, 0, 1, 1], [], []>} : vector<64x128xf32>, vector<128x128xf32>, vector<64x128xf32> -> vector<64x128xf32>
    %39 = vector.broadcast %21 : vector<1x128xf32> to vector<64x128xf32>
    %40 = arith.addf %38, %39 : vector<64x128xf32>
    %cst_35 = arith.constant 0.000000e+00 : f32
    %41 = vector.broadcast %cst_35 : f32 to vector<64x128xf32>
    %42 = arith.maximumf %40, %41 : vector<64x128xf32>
    %43 = vector.shape_cast %42 : vector<64x128xf32> to vector<8x8x128xf32>
    %cst_36 = arith.constant dense<0.000000e+00> : vector<8x128xf32>
    %44 = vector.multi_reduction <add>, %43, %cst_36 [1] : vector<8x8x128xf32> to vector<8x128xf32>
    %45 = arith.addf %26, %44 : vector<8x128xf32>
    %c0_i32_37 = arith.constant 0 : i32
    %c0_i32_38 = arith.constant 0 : i32
    %c0_i32_39 = arith.constant 0 : i32
    %c0_i32_40 = arith.constant 0 : i32
    %46 = tpu.memref_slice %arg2[%c0_i32_37, %c0_i32_38, %c0_i32_39, %c0_i32_40] : memref<2x1x262x128xf32, #tpu.memory_space<vmem>> -> memref<1x1x262x128xf32, #tpu.memory_space<vmem>>
    %47 = tpu.memref_squeeze %46 : memref<1x1x262x128xf32, #tpu.memory_space<vmem>> -> memref<262x128xf32, #tpu.memory_space<vmem>>
    %c128 = arith.constant 128 : index
    %c0_41 = arith.constant 0 : index
    %48 = vector.load %47[%c128, %c0_41] : memref<262x128xf32, #tpu.memory_space<vmem>>, vector<128x128xf32>
    %cst_42 = arith.constant dense<0.000000e+00> : vector<8x128xf32>
    %49 = tpu.matmul %45, %48, %cst_42 {dimension_numbers = #tpu.dot_dimension_numbers<[1], [0], [0], [1], [0, 0, 1, 1], [], []>} : vector<8x128xf32>, vector<128x128xf32>, vector<8x128xf32> -> vector<8x128xf32>
    %50 = arith.addf %6, %49 : vector<8x128xf32>
    %c1 = arith.constant 1 : index
    %c0_43 = arith.constant 0 : index
    %c0_44 = arith.constant 0 : index
    %51 = vector.load %arg1[%c1, %c0_43, %c0_44] : memref<2x8x6xf32, #tpu.memory_space<vmem>>, vector<1x8x6xf32>
    %52 = vector.shape_cast %51 : vector<1x8x6xf32> to vector<8x6xf32>
    %53 = vector.extract_strided_slice %52 {offsets = [0, 2], sizes = [8, 4], strides = [1, 1]} : vector<8x6xf32> to vector<8x4xf32>
    %c1_i32_45 = arith.constant 1 : i32
    %c0_i32_46 = arith.constant 0 : i32
    %c0_i32_47 = arith.constant 0 : i32
    %c0_i32_48 = arith.constant 0 : i32
    %54 = tpu.memref_slice %arg2[%c1_i32_45, %c0_i32_46, %c0_i32_47, %c0_i32_48] : memref<2x1x262x128xf32, #tpu.memory_space<vmem>> -> memref<1x1x262x128xf32, #tpu.memory_space<vmem>>
    %55 = tpu.memref_squeeze %54 : memref<1x1x262x128xf32, #tpu.memory_space<vmem>> -> memref<262x128xf32, #tpu.memory_space<vmem>>
    %c256_49 = arith.constant 256 : index
    %c0_50 = arith.constant 0 : index
    %56 = vector.load %55[%c256_49, %c0_50] : memref<262x128xf32, #tpu.memory_space<vmem>>, vector<4x128xf32>
    %c1_i32_51 = arith.constant 1 : i32
    %c0_i32_52 = arith.constant 0 : i32
    %c0_i32_53 = arith.constant 0 : i32
    %c0_i32_54 = arith.constant 0 : i32
    %57 = tpu.memref_slice %arg2[%c1_i32_51, %c0_i32_52, %c0_i32_53, %c0_i32_54] : memref<2x1x262x128xf32, #tpu.memory_space<vmem>> -> memref<1x1x262x128xf32, #tpu.memory_space<vmem>>
    %58 = tpu.memref_squeeze %57 : memref<1x1x262x128xf32, #tpu.memory_space<vmem>> -> memref<262x128xf32, #tpu.memory_space<vmem>>
    %c258_55 = arith.constant 258 : index
    %c0_56 = arith.constant 0 : index
    %59 = vector.load %58[%c258_55, %c0_56] : memref<262x128xf32, #tpu.memory_space<vmem>>, vector<2x128xf32>
    %c1_i32_57 = arith.constant 1 : i32
    %c0_i32_58 = arith.constant 0 : i32
    %c0_i32_59 = arith.constant 0 : i32
    %c0_i32_60 = arith.constant 0 : i32
    %60 = tpu.memref_slice %arg2[%c1_i32_57, %c0_i32_58, %c0_i32_59, %c0_i32_60] : memref<2x1x262x128xf32, #tpu.memory_space<vmem>> -> memref<1x1x262x128xf32, #tpu.memory_space<vmem>>
    %61 = tpu.memref_squeeze %60 : memref<1x1x262x128xf32, #tpu.memory_space<vmem>> -> memref<262x128xf32, #tpu.memory_space<vmem>>
    %c260_61 = arith.constant 260 : index
    %c0_62 = arith.constant 0 : index
    %62 = vector.load %61[%c260_61, %c0_62] : memref<262x128xf32, #tpu.memory_space<vmem>>, vector<1x128xf32>
    %c1_i32_63 = arith.constant 1 : i32
    %c0_i32_64 = arith.constant 0 : i32
    %c0_i32_65 = arith.constant 0 : i32
    %c0_i32_66 = arith.constant 0 : i32
    %63 = tpu.memref_slice %arg2[%c1_i32_63, %c0_i32_64, %c0_i32_65, %c0_i32_66] : memref<2x1x262x128xf32, #tpu.memory_space<vmem>> -> memref<1x1x262x128xf32, #tpu.memory_space<vmem>>
    %64 = tpu.memref_squeeze %63 : memref<1x1x262x128xf32, #tpu.memory_space<vmem>> -> memref<262x128xf32, #tpu.memory_space<vmem>>
    %c261_67 = arith.constant 261 : index
    %c0_68 = arith.constant 0 : index
    %65 = vector.load %64[%c261_67, %c0_68] : memref<262x128xf32, #tpu.memory_space<vmem>>, vector<1x128xf32>
    %cst_69 = arith.constant dense<0.000000e+00> : vector<8x128xf32>
    %66 = tpu.matmul %53, %56, %cst_69 {dimension_numbers = #tpu.dot_dimension_numbers<[1], [0], [0], [1], [0, 0, 1, 1], [], []>} : vector<8x4xf32>, vector<4x128xf32>, vector<8x128xf32> -> vector<8x128xf32>
    %67 = vector.broadcast %62 : vector<1x128xf32> to vector<8x128xf32>
    %68 = arith.addf %66, %67 : vector<8x128xf32>
    %cst_70 = arith.constant dense<0.000000e+00> : vector<8x128xf32>
    %69 = tpu.matmul %5, %59, %cst_70 {dimension_numbers = #tpu.dot_dimension_numbers<[1], [0], [0], [1], [0, 0, 1, 1], [], []>} : vector<8x2xf32>, vector<2x128xf32>, vector<8x128xf32> -> vector<8x128xf32>
    %cst_71 = arith.constant 0.000000e+00 : f32
    %70 = vector.broadcast %cst_71 : f32 to vector<8x128xf32>
    %71 = vector.shape_cast %69 : vector<8x128xf32> to vector<8x1x128xf32>
    %72 = vector.shape_cast %68 : vector<8x128xf32> to vector<1x8x128xf32>
    %73 = vector.broadcast %71 : vector<8x1x128xf32> to vector<8x8x128xf32>
    %74 = vector.broadcast %72 : vector<1x8x128xf32> to vector<8x8x128xf32>
    %75 = arith.addf %73, %74 : vector<8x8x128xf32>
    %cst_72 = arith.constant 0.000000e+00 : f32
    %76 = vector.broadcast %cst_72 : f32 to vector<8x8x128xf32>
    %77 = arith.maximumf %75, %76 : vector<8x8x128xf32>
    %78 = vector.shape_cast %77 : vector<8x8x128xf32> to vector<64x128xf32>
    %c1_i32_73 = arith.constant 1 : i32
    %c0_i32_74 = arith.constant 0 : i32
    %c0_i32_75 = arith.constant 0 : i32
    %c0_i32_76 = arith.constant 0 : i32
    %79 = tpu.memref_slice %arg2[%c1_i32_73, %c0_i32_74, %c0_i32_75, %c0_i32_76] : memref<2x1x262x128xf32, #tpu.memory_space<vmem>> -> memref<1x1x262x128xf32, #tpu.memory_space<vmem>>
    %80 = tpu.memref_squeeze %79 : memref<1x1x262x128xf32, #tpu.memory_space<vmem>> -> memref<262x128xf32, #tpu.memory_space<vmem>>
    %c0_77 = arith.constant 0 : index
    %c0_78 = arith.constant 0 : index
    %81 = vector.load %80[%c0_77, %c0_78] : memref<262x128xf32, #tpu.memory_space<vmem>>, vector<128x128xf32>
    %cst_79 = arith.constant dense<0.000000e+00> : vector<64x128xf32>
    %82 = tpu.matmul %78, %81, %cst_79 {dimension_numbers = #tpu.dot_dimension_numbers<[1], [0], [0], [1], [0, 0, 1, 1], [], []>} : vector<64x128xf32>, vector<128x128xf32>, vector<64x128xf32> -> vector<64x128xf32>
    %83 = vector.broadcast %65 : vector<1x128xf32> to vector<64x128xf32>
    %84 = arith.addf %82, %83 : vector<64x128xf32>
    %cst_80 = arith.constant 0.000000e+00 : f32
    %85 = vector.broadcast %cst_80 : f32 to vector<64x128xf32>
    %86 = arith.maximumf %84, %85 : vector<64x128xf32>
    %87 = vector.shape_cast %86 : vector<64x128xf32> to vector<8x8x128xf32>
    %cst_81 = arith.constant dense<0.000000e+00> : vector<8x128xf32>
    %88 = vector.multi_reduction <add>, %87, %cst_81 [1] : vector<8x8x128xf32> to vector<8x128xf32>
    %89 = arith.addf %70, %88 : vector<8x128xf32>
    %c1_i32_82 = arith.constant 1 : i32
    %c0_i32_83 = arith.constant 0 : i32
    %c0_i32_84 = arith.constant 0 : i32
    %c0_i32_85 = arith.constant 0 : i32
    %90 = tpu.memref_slice %arg2[%c1_i32_82, %c0_i32_83, %c0_i32_84, %c0_i32_85] : memref<2x1x262x128xf32, #tpu.memory_space<vmem>> -> memref<1x1x262x128xf32, #tpu.memory_space<vmem>>
    %91 = tpu.memref_squeeze %90 : memref<1x1x262x128xf32, #tpu.memory_space<vmem>> -> memref<262x128xf32, #tpu.memory_space<vmem>>
    %c128_86 = arith.constant 128 : index
    %c0_87 = arith.constant 0 : index
    %92 = vector.load %91[%c128_86, %c0_87] : memref<262x128xf32, #tpu.memory_space<vmem>>, vector<128x128xf32>
    %cst_88 = arith.constant dense<0.000000e+00> : vector<8x128xf32>
    %93 = tpu.matmul %89, %92, %cst_88 {dimension_numbers = #tpu.dot_dimension_numbers<[1], [0], [0], [1], [0, 0, 1, 1], [], []>} : vector<8x128xf32>, vector<128x128xf32>, vector<8x128xf32> -> vector<8x128xf32>
    %94 = arith.addf %50, %93 : vector<8x128xf32>
    %c0_i32_89 = arith.constant 0 : i32
    %c0_i32_90 = arith.constant 0 : i32
    %c0_i32_91 = arith.constant 0 : i32
    %95 = tpu.memref_slice %arg3[%c0_i32_89, %c0_i32_90, %c0_i32_91] : memref<1x262x128xf32, #tpu.memory_space<vmem>> -> memref<1x262x128xf32, #tpu.memory_space<vmem>>
    %96 = tpu.memref_squeeze %95 : memref<1x262x128xf32, #tpu.memory_space<vmem>> -> memref<262x128xf32, #tpu.memory_space<vmem>>
    %c256_92 = arith.constant 256 : index
    %c0_93 = arith.constant 0 : index
    %97 = vector.load %96[%c256_92, %c0_93] : memref<262x128xf32, #tpu.memory_space<vmem>>, vector<2x128xf32>
    %c0_i32_94 = arith.constant 0 : i32
    %c0_i32_95 = arith.constant 0 : i32
    %c0_i32_96 = arith.constant 0 : i32
    %98 = tpu.memref_slice %arg3[%c0_i32_94, %c0_i32_95, %c0_i32_96] : memref<1x262x128xf32, #tpu.memory_space<vmem>> -> memref<1x262x128xf32, #tpu.memory_space<vmem>>
    %99 = tpu.memref_squeeze %98 : memref<1x262x128xf32, #tpu.memory_space<vmem>> -> memref<262x128xf32, #tpu.memory_space<vmem>>
    %c258_97 = arith.constant 258 : index
    %c0_98 = arith.constant 0 : index
    %100 = vector.load %99[%c258_97, %c0_98] : memref<262x128xf32, #tpu.memory_space<vmem>>, vector<1x128xf32>
    %c0_i32_99 = arith.constant 0 : i32
    %c0_i32_100 = arith.constant 0 : i32
    %c0_i32_101 = arith.constant 0 : i32
    %101 = tpu.memref_slice %arg3[%c0_i32_99, %c0_i32_100, %c0_i32_101] : memref<1x262x128xf32, #tpu.memory_space<vmem>> -> memref<1x262x128xf32, #tpu.memory_space<vmem>>
    %102 = tpu.memref_squeeze %101 : memref<1x262x128xf32, #tpu.memory_space<vmem>> -> memref<262x128xf32, #tpu.memory_space<vmem>>
    %c259 = arith.constant 259 : index
    %c0_102 = arith.constant 0 : index
    %103 = vector.load %102[%c259, %c0_102] : memref<262x128xf32, #tpu.memory_space<vmem>>, vector<1x128xf32>
    %c0_i32_103 = arith.constant 0 : i32
    %c0_i32_104 = arith.constant 0 : i32
    %c0_i32_105 = arith.constant 0 : i32
    %104 = tpu.memref_slice %arg3[%c0_i32_103, %c0_i32_104, %c0_i32_105] : memref<1x262x128xf32, #tpu.memory_space<vmem>> -> memref<1x262x128xf32, #tpu.memory_space<vmem>>
    %105 = tpu.memref_squeeze %104 : memref<1x262x128xf32, #tpu.memory_space<vmem>> -> memref<262x128xf32, #tpu.memory_space<vmem>>
    %c260_106 = arith.constant 260 : index
    %c0_107 = arith.constant 0 : index
    %106 = vector.load %105[%c260_106, %c0_107] : memref<262x128xf32, #tpu.memory_space<vmem>>, vector<1x128xf32>
    %c0_i32_108 = arith.constant 0 : i32
    %c0_i32_109 = arith.constant 0 : i32
    %c0_i32_110 = arith.constant 0 : i32
    %107 = tpu.memref_slice %arg3[%c0_i32_108, %c0_i32_109, %c0_i32_110] : memref<1x262x128xf32, #tpu.memory_space<vmem>> -> memref<1x262x128xf32, #tpu.memory_space<vmem>>
    %108 = tpu.memref_squeeze %107 : memref<1x262x128xf32, #tpu.memory_space<vmem>> -> memref<262x128xf32, #tpu.memory_space<vmem>>
    %c261_111 = arith.constant 261 : index
    %c0_112 = arith.constant 0 : index
    %109 = vector.load %108[%c261_111, %c0_112] : memref<262x128xf32, #tpu.memory_space<vmem>>, vector<1x128xf32>
    %cst_113 = arith.constant dense<0.000000e+00> : vector<8x128xf32>
    %110 = tpu.matmul %5, %97, %cst_113 {dimension_numbers = #tpu.dot_dimension_numbers<[1], [0], [0], [1], [0, 0, 1, 1], [], []>} : vector<8x2xf32>, vector<2x128xf32>, vector<8x128xf32> -> vector<8x128xf32>
    %111 = arith.addf %94, %110 : vector<8x128xf32>
    %112 = vector.broadcast %100 : vector<1x128xf32> to vector<8x128xf32>
    %113 = arith.addf %111, %112 : vector<8x128xf32>
    %cst_114 = arith.constant 8.000000e+00 : f32
    %114 = vector.broadcast %cst_114 : f32 to vector<1x128xf32>
    %115 = arith.mulf %114, %109 : vector<1x128xf32>
    %116 = vector.broadcast %115 : vector<1x128xf32> to vector<8x128xf32>
    %117 = arith.addf %113, %116 : vector<8x128xf32>
    %cst_115 = arith.constant 0.000000e+00 : f32
    %118 = vector.broadcast %cst_115 : f32 to vector<8x128xf32>
    %119 = arith.maximumf %117, %118 : vector<8x128xf32>
    %c0_i32_116 = arith.constant 0 : i32
    %c0_i32_117 = arith.constant 0 : i32
    %c0_i32_118 = arith.constant 0 : i32
    %120 = tpu.memref_slice %arg3[%c0_i32_116, %c0_i32_117, %c0_i32_118] : memref<1x262x128xf32, #tpu.memory_space<vmem>> -> memref<1x262x128xf32, #tpu.memory_space<vmem>>
    %121 = tpu.memref_squeeze %120 : memref<1x262x128xf32, #tpu.memory_space<vmem>> -> memref<262x128xf32, #tpu.memory_space<vmem>>
    %c0_119 = arith.constant 0 : index
    %c0_120 = arith.constant 0 : index
    %122 = vector.load %121[%c0_119, %c0_120] : memref<262x128xf32, #tpu.memory_space<vmem>>, vector<128x128xf32>
    %cst_121 = arith.constant dense<0.000000e+00> : vector<8x128xf32>
    %123 = tpu.matmul %119, %122, %cst_121 {dimension_numbers = #tpu.dot_dimension_numbers<[1], [0], [0], [1], [0, 0, 1, 1], [], []>} : vector<8x128xf32>, vector<128x128xf32>, vector<8x128xf32> -> vector<8x128xf32>
    %124 = vector.broadcast %103 : vector<1x128xf32> to vector<8x128xf32>
    %125 = arith.addf %123, %124 : vector<8x128xf32>
    %cst_122 = arith.constant 0.000000e+00 : f32
    %126 = vector.broadcast %cst_122 : f32 to vector<8x128xf32>
    %127 = arith.maximumf %125, %126 : vector<8x128xf32>
    %c0_i32_123 = arith.constant 0 : i32
    %c0_i32_124 = arith.constant 0 : i32
    %c0_i32_125 = arith.constant 0 : i32
    %128 = tpu.memref_slice %arg3[%c0_i32_123, %c0_i32_124, %c0_i32_125] : memref<1x262x128xf32, #tpu.memory_space<vmem>> -> memref<1x262x128xf32, #tpu.memory_space<vmem>>
    %129 = tpu.memref_squeeze %128 : memref<1x262x128xf32, #tpu.memory_space<vmem>> -> memref<262x128xf32, #tpu.memory_space<vmem>>
    %c128_126 = arith.constant 128 : index
    %c0_127 = arith.constant 0 : index
    %130 = vector.load %129[%c128_126, %c0_127] : memref<262x128xf32, #tpu.memory_space<vmem>>, vector<128x128xf32>
    %cst_128 = arith.constant dense<0.000000e+00> : vector<8x128xf32>
    %131 = tpu.matmul %127, %130, %cst_128 {dimension_numbers = #tpu.dot_dimension_numbers<[1], [0], [0], [1], [0, 0, 1, 1], [], []>} : vector<8x128xf32>, vector<128x128xf32>, vector<8x128xf32> -> vector<8x128xf32>
    %132 = vector.broadcast %106 : vector<1x128xf32> to vector<8x128xf32>
    %133 = arith.addf %131, %132 : vector<8x128xf32>
    %c0_129 = arith.constant 0 : index
    %c0_130 = arith.constant 0 : index
    %c0_131 = arith.constant 0 : index
    %134 = vector.load %arg4[%c0_129, %c0_130, %c0_131] : memref<1x8x128xf32, #tpu.memory_space<vmem>>, vector<1x8x128xf32>
    %135 = vector.shape_cast %134 : vector<1x8x128xf32> to vector<8x128xf32>
    %136 = vector.shape_cast %133 : vector<8x128xf32> to vector<1x8x128xf32>
    tpu.vector_store %arg4[%c0_129, %c0_130, %c0_131], %136 {strides = array<i32>} : memref<1x8x128xf32, #tpu.memory_space<vmem>>, vector<1x8x128xf32>,
    return
  }
  func.func @transform_0(%arg0: i32) -> (i32, i32, i32) {
    %c0_i32 = arith.constant 0 : i32
    %c0_i32_0 = arith.constant 0 : i32
    %c0_i32_1 = arith.constant 0 : i32
    %c0_i32_2 = arith.constant 0 : i32
    return %c0_i32, %c0_i32_0, %c0_i32_1 : i32, i32, i32
  }
  func.func @transform_1(%arg0: i32) -> (i32, i32, i32, i32) {
    %c0_i32 = arith.constant 0 : i32
    %c0_i32_0 = arith.constant 0 : i32
    %c0_i32_1 = arith.constant 0 : i32
    %c0_i32_2 = arith.constant 0 : i32
    return %c0_i32, %arg0, %c0_i32_0, %c0_i32_1 : i32, i32, i32, i32
  }
  func.func @transform_2(%arg0: i32) -> (i32, i32, i32) {
    %c0_i32 = arith.constant 0 : i32
    %c0_i32_0 = arith.constant 0 : i32
    %c0_i32_1 = arith.constant 0 : i32
    return %arg0, %c0_i32, %c0_i32_0 : i32, i32, i32
  }
  func.func @transform_3(%arg0: i32) -> (i32, i32, i32) {
    %c0_i32 = arith.constant 0 : i32
    %c0_i32_0 = arith.constant 0 : i32
    %c0_i32_1 = arith.constant 0 : i32
    return %arg0, %c0_i32, %c0_i32_0 : i32, i32, i32
  }
}

</mosaic_0001>

<bundles_post_ra>
// kernel: pairwise_interact.1
= control target key start
LH: loop header
LB: loop body
LE: loop exit
PB: predicated region body
PF: predicated region fallthrough
CT: control target
= control target key end

     0   :  { %s2649_s12 = smov 0   ;;  %s2651_s13 = smov 0   ;;  %s3092_s0 = inlined_call_operand.vmem [shape: f32[2,8,6], index: 0, kind: input, shape index: {}]   ;;  %s3093_s1 = inlined_call_operand.vmem [shape: f32[2,2,262,128], index: 1, kind: input, shape index: {}]   ;;  %s3094_s2 = inlined_call_operand.vmem [shape: f32[2,262,128], index: 2, kind: input, shape index: {}]   ;;  %s3095_s3 = inlined_call_operand.vmem [shape: f32[2,8,128], index: 3, kind: output, shape index: {}]  }
   0x1   :  { %s2653_s14 = smov 0  }
   0x2 LB: > { %s2665_s15 = sadd.s32 4294967295, %s2622_s14   ;;  %s2668_s16 = sadd.s32 1, %s2622_s14   ;;  %s2622_s14 = sphi %s2653_s14, %s3098_s14   ;;  %s2618_s13 = sphi %s2651_s13, %s3097_s13   ;;  %s2614_s12 = sphi %s2649_s12, %s3096_s12  }
   0x3   : > { %s38_s17 = ssub.s32 %s2622_s14, %s2668_s16  ;;  %s41_s18 = sadd.s32 1, %s2618_s13 }
   0x4   : > { %p39_p0 = scmp.eq.s32.totalorder %s38_s17, 0  ;;  %p48_p1 = scmp.ne.s32.totalorder %s2618_s13, %s2614_s12 }
   0x5   : > { %p49_p2 = scmp.eq.s32.totalorder %s2622_s14, 0  ;;  %p1966_p4 = scmp.ge.s32.totalorder %s2622_s14, 2 }
   0x6   : > { %s2677_s19 = scalar_select %p39_p0, %s2618_s13, %s41_s18  }
   0x7   : > { %p50_p3 = por %p49_p2, %p48_p1  ;;  %129 = sbr.rel (%p1966_p4) target bundleno = 52 (0x34), region = 20 }
   0xe   : > { %132 = sbr.rel (!%p50_p3) target bundleno = 52 (0x34), region = 24  ;;  %s134_s20 = sand.u32 (%p50_p3), 1, %s2618_s13  }
   0xf   : > { %s2568_s21 = smul.u32 (%p50_p3), 264, %s2622_s14 }
  0x10   : > { %s2567_s22 = smul.u32 (%p50_p3), 528, %s134_s20 }
  0x11   : > { %s2685_s25 = scalar_lea.vmem (%p50_p3), %s3093_s1, %s2568_s21 }
  0x12   : > { %v297_v0 = vld [vmem:[%s2685_s25] sm:$0xff] (%p50_p3)  ;;  %v299_v1 = vld [vmem:[%s2685_s25 + $0x8] sm:$0xff] (%p50_p3)  ;;  %v301_v2 = vld [vmem:[%s2685_s25 + $0x10] sm:$0xff] (%p50_p3)  ;;  %s2690_s26 = scalar_lea.vmem (%p50_p3), [#allocation2], %s2567_s22 }
  0x13   : > { %298 = vst [vmem:[%s2690_s26] sm:$0xff] (%p50_p3), %v297_v0  ;;  %300 = vst [vmem:[%s2690_s26 + $0x8] sm:$0xff] (%p50_p3), %v299_v1  ;;  %v303_v3 = vld [vmem:[%s2685_s25 + $0x18] sm:$0xff] (%p50_p3)  ;;  %v305_v4 = vld [vmem:[%s2685_s25 + $0x20] sm:$0xff] (%p50_p3) }
  0x14   : > { %302 = vst [vmem:[%s2690_s26 + $0x10] sm:$0xff] (%p50_p3), %v301_v2  ;;  %v307_v5 = vld [vmem:[%s2685_s25 + $0x28] sm:$0xff] (%p50_p3)  ;;  %304 = vst [vmem:[%s2690_s26 + $0x18] sm:$0xff] (%p50_p3), %v303_v3  ;;  %v309_v6 = vld [vmem:[%s2685_s25 + $0x30] sm:$0xff] (%p50_p3) }
  0x15   : > { %306 = vst [vmem:[%s2690_s26 + $0x20] sm:$0xff] %v305_v4  ;;  %308 = vst [vmem:[%s2690_s26 + $0x28] sm:$0xff] %v307_v5  ;;  %v311_v7 = vld [vmem:[%s2685_s25 + $0x38] sm:$0xff]  ;;  %v313_v8 = vld [vmem:[%s2685_s25 + $0x40] sm:$0xff] }
  0x16   : > { %310 = vst [vmem:[%s2690_s26 + $0x30] sm:$0xff] %v309_v6  ;;  %312 = vst [vmem:[%s2690_s26 + $0x38] sm:$0xff] %v311_v7  ;;  %v315_v9 = vld [vmem:[%s2685_s25 + $0x48] sm:$0xff]  ;;  %v317_v10 = vld [vmem:[%s2685_s25 + $0x50] sm:$0xff] }
  0x17   : > { %314 = vst [vmem:[%s2690_s26 + $0x40] sm:$0xff] %v313_v8  ;;  %v319_v11 = vld [vmem:[%s2685_s25 + $0x58] sm:$0xff]  ;;  %316 = vst [vmem:[%s2690_s26 + $0x48] sm:$0xff] %v315_v9  ;;  %v321_v12 = vld [vmem:[%s2685_s25 + $0x60] sm:$0xff] }
  0x18   : > { %318 = vst [vmem:[%s2690_s26 + $0x50] sm:$0xff] %v317_v10  ;;  %320 = vst [vmem:[%s2690_s26 + $0x58] sm:$0xff] %v319_v11  ;;  %v323_v13 = vld [vmem:[%s2685_s25 + $0x68] sm:$0xff]  ;;  %v325_v14 = vld [vmem:[%s2685_s25 + $0x70] sm:$0xff] }
  0x19   : > { %322 = vst [vmem:[%s2690_s26 + $0x60] sm:$0xff] %v321_v12  ;;  %324 = vst [vmem:[%s2690_s26 + $0x68] sm:$0xff] %v323_v13  ;;  %v327_v15 = vld [vmem:[%s2685_s25 + $0x78] sm:$0xff]  ;;  %v329_v16 = vld [vmem:[%s2685_s25 + $0x80] sm:$0xff] }
  0x1a   : > { %326 = vst [vmem:[%s2690_s26 + $0x70] sm:$0xff] %v325_v14  ;;  %v331_v17 = vld [vmem:[%s2685_s25 + $0x88] sm:$0xff]  ;;  %328 = vst [vmem:[%s2690_s26 + $0x78] sm:$0xff] %v327_v15  ;;  %v333_v18 = vld [vmem:[%s2685_s25 + $0x90] sm:$0xff] }
  0x1b   : > { %330 = vst [vmem:[%s2690_s26 + $0x80] sm:$0xff] %v329_v16  ;;  %332 = vst [vmem:[%s2690_s26 + $0x88] sm:$0xff] %v331_v17  ;;  %v335_v19 = vld [vmem:[%s2685_s25 + $0x98] sm:$0xff]  ;;  %v337_v20 = vld [vmem:[%s2685_s25 + $0xa0] sm:$0xff] }
  0x1c   : > { %334 = vst [vmem:[%s2690_s26 + $0x90] sm:$0xff] %v333_v18  ;;  %336 = vst [vmem:[%s2690_s26 + $0x98] sm:$0xff] %v335_v19  ;;  %v339_v21 = vld [vmem:[%s2685_s25 + $0xa8] sm:$0xff]  ;;  %v341_v22 = vld [vmem:[%s2685_s25 + $0xb0] sm:$0xff] }
  0x1d   : > { %338 = vst [vmem:[%s2690_s26 + $0xa0] sm:$0xff] %v337_v20  ;;  %v343_v23 = vld [vmem:[%s2685_s25 + $0xb8] sm:$0xff]  ;;  %340 = vst [vmem:[%s2690_s26 + $0xa8] sm:$0xff] %v339_v21  ;;  %v345_v24 = vld [vmem:[%s2685_s25 + $0xc0] sm:$0xff] }
  0x1e   : > { %342 = vst [vmem:[%s2690_s26 + $0xb0] sm:$0xff] %v341_v22  ;;  %344 = vst [vmem:[%s2690_s26 + $0xb8] sm:$0xff] %v343_v23  ;;  %v347_v25 = vld [vmem:[%s2685_s25 + $0xc8] sm:$0xff]  ;;  %v349_v26 = vld [vmem:[%s2685_s25 + $0xd0] sm:$0xff] }
  0x1f   : > { %346 = vst [vmem:[%s2690_s26 + $0xc0] sm:$0xff] %v345_v24  ;;  %348 = vst [vmem:[%s2690_s26 + $0xc8] sm:$0xff] %v347_v25  ;;  %v351_v27 = vld [vmem:[%s2685_s25 + $0xd8] sm:$0xff]  ;;  %v353_v28 = vld [vmem:[%s2685_s25 + $0xe0] sm:$0xff] }
  0x20   : > { %350 = vst [vmem:[%s2690_s26 + $0xd0] sm:$0xff] %v349_v26  ;;  %v355_v29 = vld [vmem:[%s2685_s25 + $0xe8] sm:$0xff]  ;;  %352 = vst [vmem:[%s2690_s26 + $0xd8] sm:$0xff] %v351_v27  ;;  %v357_v30 = vld [vmem:[%s2685_s25 + $0xf0] sm:$0xff] }
  0x21   : > { %354 = vst [vmem:[%s2690_s26 + $0xe0] sm:$0xff] %v353_v28  ;;  %356 = vst [vmem:[%s2690_s26 + $0xe8] sm:$0xff] %v355_v29  ;;  %v359_v31 = vld [vmem:[%s2685_s25 + $0xf8] sm:$0xff]  ;;  %v361_v32 = vld [vmem:[%s2685_s25 + $0x100] sm:$0xff] }
  0x22   : > { %358 = vst [vmem:[%s2690_s26 + $0xf0] sm:$0xff] %v357_v30  ;;  %360 = vst [vmem:[%s2690_s26 + $0xf8] sm:$0xff] %v359_v31  ;;  %v363_v33 = vld [vmem:[%s2685_s25 + $0x210] sm:$0xff]  ;;  %v365_v34 = vld [vmem:[%s2685_s25 + $0x218] sm:$0xff] }
  0x23   : > { %362 = vst [vmem:[%s2690_s26 + $0x100] sm:$0xff] %v361_v32  ;;  %v367_v35 = vld [vmem:[%s2685_s25 + $0x220] sm:$0xff]  ;;  %364 = vst [vmem:[%s2690_s26 + $0x108] sm:$0xff] %v363_v33  ;;  %v369_v36 = vld [vmem:[%s2685_s25 + $0x228] sm:$0xff] }
  0x24   : > { %366 = vst [vmem:[%s2690_s26 + $0x110] sm:$0xff] %v365_v34  ;;  %368 = vst [vmem:[%s2690_s26 + $0x118] sm:$0xff] %v367_v35  ;;  %v371_v37 = vld [vmem:[%s2685_s25 + $0x230] sm:$0xff]  ;;  %v373_v38 = vld [vmem:[%s2685_s25 + $0x238] sm:$0xff] }
  0x25   : > { %370 = vst [vmem:[%s2690_s26 + $0x120] sm:$0xff] %v369_v36  ;;  %372 = vst [vmem:[%s2690_s26 + $0x128] sm:$0xff] %v371_v37  ;;  %v375_v39 = vld [vmem:[%s2685_s25 + $0x240] sm:$0xff]  ;;  %v377_v40 = vld [vmem:[%s2685_s25 + $0x248] sm:$0xff] }
  0x26   : > { %374 = vst [vmem:[%s2690_s26 + $0x130] sm:$0xff] %v373_v38  ;;  %v379_v41 = vld [vmem:[%s2685_s25 + $0x250] sm:$0xff]  ;;  %376 = vst [vmem:[%s2690_s26 + $0x138] sm:$0xff] %v375_v39  ;;  %v381_v42 = vld [vmem:[%s2685_s25 + $0x258] sm:$0xff] }
  0x27   : > { %378 = vst [vmem:[%s2690_s26 + $0x140] sm:$0xff] %v377_v40  ;;  %380 = vst [vmem:[%s2690_s26 + $0x148] sm:$0xff] %v379_v41  ;;  %v383_v43 = vld [vmem:[%s2685_s25 + $0x260] sm:$0xff]  ;;  %v385_v44 = vld [vmem:[%s2685_s25 + $0x268] sm:$0xff] }
  0x28   : > { %382 = vst [vmem:[%s2690_s26 + $0x150] sm:$0xff] %v381_v42  ;;  %384 = vst [vmem:[%s2690_s26 + $0x158] sm:$0xff] %v383_v43  ;;  %v387_v45 = vld [vmem:[%s2685_s25 + $0x270] sm:$0xff]  ;;  %v389_v46 = vld [vmem:[%s2685_s25 + $0x278] sm:$0xff] }
  0x29   : > { %386 = vst [vmem:[%s2690_s26 + $0x160] sm:$0xff] %v385_v44  ;;  %v391_v47 = vld [vmem:[%s2685_s25 + $0x280] sm:$0xff]  ;;  %388 = vst [vmem:[%s2690_s26 + $0x168] sm:$0xff] %v387_v45  ;;  %v393_v48 = vld [vmem:[%s2685_s25 + $0x288] sm:$0xff] }
  0x2a   : > { %390 = vst [vmem:[%s2690_s26 + $0x170] sm:$0xff] %v389_v46  ;;  %392 = vst [vmem:[%s2690_s26 + $0x178] sm:$0xff] %v391_v47  ;;  %v395_v49 = vld [vmem:[%s2685_s25 + $0x290] sm:$0xff]  ;;  %v397_v50 = vld [vmem:[%s2685_s25 + $0x298] sm:$0xff] }
  0x2b   : > { %394 = vst [vmem:[%s2690_s26 + $0x180] sm:$0xff] %v393_v48  ;;  %396 = vst [vmem:[%s2690_s26 + $0x188] sm:$0xff] %v395_v49  ;;  %v399_v51 = vld [vmem:[%s2685_s25 + $0x2a0] sm:$0xff]  ;;  %v401_v52 = vld [vmem:[%s2685_s25 + $0x2a8] sm:$0xff] }
  0x2c   : > { %398 = vst [vmem:[%s2690_s26 + $0x190] sm:$0xff] %v397_v50  ;;  %v403_v53 = vld [vmem:[%s2685_s25 + $0x2b0] sm:$0xff]  ;;  %400 = vst [vmem:[%s2690_s26 + $0x198] sm:$0xff] %v399_v51  ;;  %v405_v54 = vld [vmem:[%s2685_s25 + $0x2b8] sm:$0xff] }
  0x2d   : > { %402 = vst [vmem:[%s2690_s26 + $0x1a0] sm:$0xff] %v401_v52  ;;  %404 = vst [vmem:[%s2690_s26 + $0x1a8] sm:$0xff] %v403_v53  ;;  %v407_v55 = vld [vmem:[%s2685_s25 + $0x2c0] sm:$0xff]  ;;  %v409_v56 = vld [vmem:[%s2685_s25 + $0x2c8] sm:$0xff] }
  0x2e   : > { %406 = vst [vmem:[%s2690_s26 + $0x1b0] sm:$0xff] %v405_v54  ;;  %408 = vst [vmem:[%s2690_s26 + $0x1b8] sm:$0xff] %v407_v55  ;;  %v411_v57 = vld [vmem:[%s2685_s25 + $0x2d0] sm:$0xff]  ;;  %v413_v58 = vld [vmem:[%s2685_s25 + $0x2d8] sm:$0xff] }
  0x2f   : > { %410 = vst [vmem:[%s2690_s26 + $0x1c0] sm:$0xff] %v409_v56  ;;  %v415_v59 = vld [vmem:[%s2685_s25 + $0x2e0] sm:$0xff]  ;;  %412 = vst [vmem:[%s2690_s26 + $0x1c8] sm:$0xff] %v411_v57  ;;  %v417_v60 = vld [vmem:[%s2685_s25 + $0x2e8] sm:$0xff] }
  0x30   : > { %414 = vst [vmem:[%s2690_s26 + $0x1d0] sm:$0xff] %v413_v58  ;;  %416 = vst [vmem:[%s2690_s26 + $0x1d8] sm:$0xff] %v415_v59  ;;  %v419_v61 = vld [vmem:[%s2685_s25 + $0x2f0] sm:$0xff]  ;;  %v421_v62 = vld [vmem:[%s2685_s25 + $0x2f8] sm:$0xff] }
  0x31   : > { %418 = vst [vmem:[%s2690_s26 + $0x1e0] sm:$0xff] %v417_v60  ;;  %420 = vst [vmem:[%s2690_s26 + $0x1e8] sm:$0xff] %v419_v61  ;;  %v423_v63 = vld [vmem:[%s2685_s25 + $0x300] sm:$0xff]  ;;  %v425_v0 = vld [vmem:[%s2685_s25 + $0x308] sm:$0xff] }
  0x32   : > { %422 = vst [vmem:[%s2690_s26 + $0x1f0] sm:$0xff] %v421_v62  ;;  %v427_v1 = vld [vmem:[%s2685_s25 + $0x310] sm:$0xff]  ;;  %424 = vst [vmem:[%s2690_s26 + $0x1f8] sm:$0xff] %v423_v63 }
  0x33   : > { %426 = vst [vmem:[%s2690_s26 + $0x200] sm:$0xff] %v425_v0  ;;  %428 = vst [vmem:[%s2690_s26 + $0x208] sm:$0xff] %v427_v1 }
  0x34 PF: > { %p1968_p5 = scmp.ge.s32.totalorder %s2622_s14, 1  ;;  %p441_p6 = scmp.lt.s32.totalorder %s2622_s14, 3 }
  0x36   : > { %p442_p7 = pnand %p1968_p5, %p441_p6 }
  0x37   : > { %v1978_v2 = vld [vmem:[%s3092_s0 + $0x8] sm:$0xff] (!%p442_p7)  ;;  %s448_s29 = sand.u32 (!%p442_p7), 1, %s2614_s12   ;;  %s2624_s30 = smov (!%p442_p7), 126   ;;  %v2625_v3 = vmov (!%p442_p7), 0.0   ;;  %v487_v4 = vld [vmem:[%s3092_s0] sm:$0xff] (!%p442_p7)  ;;  %vm580_vm0 = vcmask (!%p442_p7), 1041408   ;;  %v659_v0 = vlaneseq (!%p442_p7) }
  0x38   : > { %445 = sbr.rel (%p442_p7) target bundleno = 1307 (0x51b), region = 66  ;;  %977 = vrot.lane.b32.xlu0 (!%p442_p7), %v1978_v2, %s2624_s30  ;;  %2159 = vmatprep.subr.mxu1 (!%p442_p7), %v2625_v3  ;;  %s1971_s5 = sshll.u32 (!%p442_p7), %s2665_s15, 3  ;;  %vm2626_vm1 = vmmov (!%p442_p7), 0   ;;  %vm576_vm2 = vcmask (!%p442_p7), 15360   ;;  %vm502_vm3 = vcmask (!%p442_p7), 1043456   ;;  %vm499_vm4 = vcmask (!%p442_p7), 31744  }
  0x39   : > { %s2569_s4 = smul.u32 (!%p442_p7), 528, %s448_s29  ;;  %2161 = vmatprep.mubr.msk.f32.mxu1 (!%p442_p7), %vm2626_vm1, %v2625_v3  ;;  %s485_s10 = scalar_lea.vmem (!%p442_p7), %s3092_s0, %s1971_s5  ;;  %2154 = vmatprep.subr.mxu0 (!%p442_p7), %v2625_v3  ;;  %v2627_v62 = vmov (!%p442_p7), 1966171168   ;;  %v660_v2 = vshrl.u32 (!%p442_p7), %v659_v0, 7  ;;  %vm1446_vm5 = vcmask (!%p442_p7), 1041409   ;;  %vm1448_vm6 = vcmask (!%p442_p7), 1042434  }
  0x3a   : > { %v2838_v5 = vld [vmem:[%s485_s10] sm:$0xff] (!%p442_p7)  ;;  %2156 = vmatprep.mubr.msk.f32.mxu0 (!%p442_p7), %vm2626_vm1, %v2625_v3  ;;  %v657_v63 = vunpack.c.l.s4 (!%p442_p7), %v2627_v62  ;;  %vm1450_vm7 = vcmask (!%p442_p7), 1043459   ;;  %vm1452_vm8 = vcmask (!%p442_p7), 1044484   ;;  %vm1454_vm9 = vcmask (!%p442_p7), 1045509   ;;  %p475_p8 = scmp.lt.s32.totalorder (!%p442_p7), %s2665_s15, 1 }
  0x3b   : > { %s2842_s11 = scalar_lea.vmem (!%p442_p7), [#allocation2], %s2569_s4  ;;  %vm1456_vm10 = vcmask (!%p442_p7), 1046534   ;;  %vm1458_vm11 = vcmask (!%p442_p7), 1047559  }
  0x3c   : > { %v489_v6 = vld [vmem:[%s2842_s11 + $0x102] sm:$0x3] (!%p442_p7)  ;;  %v1979_v7 = vld [vmem:[%s2842_s11 + $0x208] sm:$0xf] (!%p442_p7)  ;;  %497 = vrot.lane.b32.xlu0 (!%p442_p7), %v487_v4, %s2624_s30  ;;  %v1989_v13 = vld [vmem:[%s2842_s11 + $0x110] sm:$0xff] (!%p442_p7)  ;;  %v658_v1 = vunpack.c.0.s8 (!%p442_p7), %v657_v63 }
  0x3d   : > { %2160 = vmatpush3.msk.msra.mxu1 (!%p442_p7), %vm580_vm0, %v489_v6  ;;  %v488_v8 = vld [vmem:[%s2842_s11 + $0x100] sm:$0xf] (!%p442_p7)  ;;  %v761_v10 = vld [vmem:[%s2842_s11 + $0x8] sm:$0xff] (!%p442_p7)  ;;  %v762_v15 = vld [vmem:[%s2842_s11 + $0x10] sm:$0xff] (!%p442_p7) }
  0x3e   : > { %v760_v9 = vld [vmem:[%s2842_s11] sm:$0xff] (!%p442_p7)  ;;  %2162 = vmatmul.mubr.msk.f32.vlgmr.msra.gmra.mrb[0].mxu1 (!%p442_p7), %vm576_vm2, %v2838_v5  ;;  %2208 = vmatprep.subr.mxu1 (!%p442_p7), %v2625_v3  ;;  %v1988_v12 = vld [vmem:[%s2842_s11 + $0x108] sm:$0xff] (!%p442_p7)  ;;  %v763_v18 = vld [vmem:[%s2842_s11 + $0x18] sm:$0xff] (!%p442_p7)  ;;  %v661_v4 = vsub.s32 (!%p442_p7), %v658_v1, %v660_v2 }
  0x3f   : > { %v2407_v11 = vpack.c.bf16 %v761_v10, %v760_v9  ;;  %2209 = vmatpush3.msk.msra.mxu1 %vm502_vm3, %v1979_v7  ;;  %2210 = vmatprep.mubr.msk.f32.mxu1 %vm2626_vm1, %v2625_v3  ;;  %v1980_v14 = vld [vmem:[%s2842_s11 + $0x20a] sm:$0x3]  ;;  %v2439_v16 = vpack.c.bf16 %v1989_v13, %v1988_v12  ;;  %v1990_v19 = vld [vmem:[%s2842_s11 + $0x118] sm:$0xff]  ;;  %v1991_v20 = vld [vmem:[%s2842_s11 + $0x120] sm:$0xff]  ;;  %v2411_v21 = vpack.c.bf16 %v763_v18, %v762_v15  ;;  %s3100_s15 = smov (!%p475_p8, %s2665_s15), 1 }
  0x40   : > { %2213 = vmatprep.subr.mxu1 %v2625_v3  ;;  %2155 = vmatpush3.msk.msra.mxu0 %vm502_vm3, %v488_v8  ;;  %v764_v22 = vld [vmem:[%s2842_s11 + $0x20] sm:$0xff]  ;;  %v2443_v23 = vpack.c.bf16 %v1991_v20, %v1990_v19  ;;  %v765_v25 = vld [vmem:[%s2842_s11 + $0x28] sm:$0xff]  ;;  %v1993_v27 = vld [vmem:[%s2842_s11 + $0x130] sm:$0xff]  ;;  %s2570_s12 = smul.u32 264, %s3100_s15  ;;  %s1970_s20 = sshll.u32 %s3100_s15, 3 }
  0x41   : > { %2408 = vmatprep.subr.bf16.mxu0 %v2407_v11  ;;  %v1992_v26 = vld [vmem:[%s2842_s11 + $0x128] sm:$0xff]  ;;  %v2415_v28 = vpack.c.bf16 %v765_v25, %v764_v22  ;;  %v766_v29 = vld [vmem:[%s2842_s11 + $0x30] sm:$0xff]  ;;  %v767_v31 = vld [vmem:[%s2842_s11 + $0x38] sm:$0xff]  ;;  %s483_s23 = scalar_lea.vmem %s3095_s3, %s1970_s20 }
  0x42   : > { %v2447_v30 = vpack.c.bf16 %v1993_v27, %v1992_v26  ;;  %v1994_v32 = vld [vmem:[%s2842_s11 + $0x138] sm:$0xff]  ;;  %v1995_v33 = vld [vmem:[%s2842_s11 + $0x140] sm:$0xff]  ;;  %v2419_v34 = vpack.c.bf16 %v767_v31, %v766_v29  ;;  %v769_v37 = vld [vmem:[%s2842_s11 + $0x48] sm:$0xff]  ;;  %s3011_s18 = scalar_lea.vmem %s3094_s2, %s2570_s12 }
  0x43   : > { %v2451_v35 = vpack.c.bf16 %v1995_v33, %v1994_v32  ;;  %v768_v36 = vld [vmem:[%s2842_s11 + $0x40] sm:$0xff]  ;;  %v770_v39 = vld [vmem:[%s2842_s11 + $0x50] sm:$0xff]  ;;  %v771_v40 = vld [vmem:[%s2842_s11 + $0x58] sm:$0xff] }
  0x44   : > { %v2423_v38 = vpack.c.bf16 %v769_v37, %v768_v36  ;;  %v2427_v41 = vpack.c.bf16 %v771_v40, %v770_v39  ;;  %v1996_v42 = vld [vmem:[%s2842_s11 + $0x148] sm:$0xff]  ;;  %v1997_v43 = vld [vmem:[%s2842_s11 + $0x150] sm:$0xff]  ;;  %v772_v45 = vld [vmem:[%s2842_s11 + $0x60] sm:$0xff] }
  0x45   : > { %v2455_v44 = vpack.c.bf16 %v1997_v43, %v1996_v42  ;;  %v773_v46 = vld [vmem:[%s2842_s11 + $0x68] sm:$0xff]  ;;  %v1998_v48 = vld [vmem:[%s2842_s11 + $0x158] sm:$0xff]  ;;  %v1999_v49 = vld [vmem:[%s2842_s11 + $0x160] sm:$0xff] }
  0x46   : > { %v2431_v47 = vpack.c.bf16 %v773_v46, %v772_v45  ;;  %v2459_v50 = vpack.c.bf16 %v1999_v49, %v1998_v48  ;;  %v774_v51 = vld [vmem:[%s2842_s11 + $0x70] sm:$0xff]  ;;  %v775_v52 = vld [vmem:[%s2842_s11 + $0x78] sm:$0xff]  ;;  %v2000_v54 = vld [vmem:[%s2842_s11 + $0x168] sm:$0xff] }
  0x47   : > { %v2435_v53 = vpack.c.bf16 %v775_v52, %v774_v51  ;;  %v2001_v55 = vld [vmem:[%s2842_s11 + $0x170] sm:$0xff]  ;;  %v2002_v57 = vld [vmem:[%s2842_s11 + $0x178] sm:$0xff]  ;;  %v2003_v58 = vld [vmem:[%s2842_s11 + $0x180] sm:$0xff] }
  0x48   : > { %v2463_v56 = vpack.c.bf16 %v2001_v55, %v2000_v54  ;;  %v2467_v59 = vpack.c.bf16 %v2003_v58, %v2002_v57 }
  0xaa   : > { %v978_v17 = vpop.permute.xlu0 %977 }
  0xab   : > { %2211 = vmatmul.mubr.msk.f32.vlgmr.msra.gmra.mrb[2].mxu1 %vm499_vm4, %v978_v17 }
  0xac   : > { %2214 = vmatpush3.msk.msra.mxu1 %vm580_vm0, %v1980_v14  ;;  %2215 = vmatprep.mubr.msk.f32.mxu1 %vm2626_vm1, %v2625_v3 }
  0xad   : > { %2440 = vmatprep.subr.bf16.mxu1 %v2439_v16 }
  0xae   : > { %v498_v24 = vpop.permute.xlu0 %497 }
  0xaf   : > { %2157 = vmatmul.mubr.msk.f32.vlgmr.msra.gmra.mrb[0].mxu0 %vm499_vm4, %v498_v24  ;;  %2216 = vmatmul.mubr.msk.f32.vlgmr.msra.gmra.mrb[4].mxu1 %vm576_vm2, %v2838_v5 }
  0xb0   : > { %2410 = vmatpush3.bf16.msra.mxu0 %v2407_v11  ;;  %2442 = vmatpush3.bf16.msra.mxu1 %v2439_v16  ;;  %v2894_v16 = vsub.s32 0, %v660_v2 }
  0xb1   : > { %2412 = vmatprep.subr.bf16.mxu0 %v2411_v21  ;;  %2444 = vmatprep.subr.bf16.mxu1 %v2443_v23 }
  0xb4   : > { %2414 = vmatpush3.bf16.msra.mxu0 %v2411_v21  ;;  %2446 = vmatpush3.bf16.msra.mxu1 %v2443_v23  ;;  %v1972_v21 = vld [vmem:[%s2842_s11 + $0x104] ss:$0 sm:$0xff] }
  0xb5   : > { %2416 = vmatprep.subr.bf16.mxu0 %v2415_v28  ;;  %2448 = vmatprep.subr.bf16.mxu1 %v2447_v30 }
  0xb8   : > { %2418 = vmatpush3.bf16.msra.mxu0 %v2415_v28  ;;  %2450 = vmatpush3.bf16.msra.mxu1 %v2447_v30 }
  0xb9   : > { %2420 = vmatprep.subr.bf16.mxu0 %v2419_v34  ;;  %2452 = vmatprep.subr.bf16.mxu1 %v2451_v35 }
  0xbc   : > { %2422 = vmatpush3.bf16.msra.mxu0 %v2419_v34  ;;  %2454 = vmatpush3.bf16.msra.mxu1 %v2451_v35 }
  0xbd   : > { %2424 = vmatprep.subr.bf16.mxu0 %v2423_v38  ;;  %2456 = vmatprep.subr.bf16.mxu1 %v2455_v44 }
  0xc0   : > { %2426 = vmatpush3.bf16.msra.mxu0 %v2423_v38  ;;  %2458 = vmatpush3.bf16.msra.mxu1 %v2455_v44  ;;  %v1983_v38 = vld [vmem:[%s2842_s11 + $0x20c] ss:$0 sm:$0xff] }
  0xc1   : > { %2428 = vmatprep.subr.bf16.mxu0 %v2427_v41  ;;  %2460 = vmatprep.subr.bf16.mxu1 %v2459_v50 }
  0xc4   : > { %2430 = vmatpush3.bf16.msra.mxu0 %v2427_v41  ;;  %2462 = vmatpush3.bf16.msra.mxu1 %v2459_v50 }
  0xc5   : > { %2432 = vmatprep.subr.bf16.mxu0 %v2431_v47  ;;  %2464 = vmatprep.subr.bf16.mxu1 %v2463_v56 }
  0xc8   : > { %2434 = vmatpush3.bf16.msra.mxu0 %v2431_v47  ;;  %2466 = vmatpush3.bf16.msra.mxu1 %v2463_v56 }
  0xc9   : > { %2436 = vmatprep.subr.bf16.mxu0 %v2435_v53  ;;  %2468 = vmatprep.subr.bf16.mxu1 %v2467_v59 }
  0xcc   : > { %2438 = vmatpush3.bf16.msra.mxu0 %v2435_v53  ;;  %2470 = vmatpush3.bf16.msra.mxu1 %v2467_v59 }
 0x111   : > { %v650_v60 = vpop.f32.mrb[0].mxu1 }
 0x112   : > { %v2163_v61 = vpop.f32.mrb[1].mxu1  ;;  %v655_v6 = vcombine.high %v650_v60, %v650_v60  ;;  %v662_v7 = vrot.slane %v650_v60, %v661_v4 }
 0x114   : > { %v669_v8 = vrot.slane %v655_v6, %v661_v4  ;;  %v670_v9 = vcombine.high %v662_v7, %v662_v7  ;;  %v678_v12 = vrot.slane %v662_v7, %v661_v4 }
 0x116   : > { %v671_v10 = vcombine.high %v669_v8, %v669_v8  ;;  %v692_v11 = vrot.slane %v670_v9, %v661_v4  ;;  %v685_v13 = vrot.slane %v669_v8, %v661_v4  ;;  %v700_v18 = vcombine.high %v678_v12, %v678_v12 }
 0x117   : > { %v707_v23 = vrot.slane %v678_v12, %v2894_v16 }
 0x118   : > { %v699_v14 = vrot.slane %v671_v10, %v661_v4  ;;  %v702_v15 = vcombine.high %v692_v11, %v692_v11  ;;  %v701_v20 = vcombine.high %v685_v13, %v685_v13  ;;  %v711_v24 = vrot.slane %v692_v11, %v2894_v16 }
 0x119   : > { %v715_v33 = vrot.slane %v700_v18, %v2894_v16  ;;  %v723_v34 = vrot.slane %v685_v13, %v2894_v16 }
 0x11a   : > { %v703_v22 = vcombine.high %v699_v14, %v699_v14  ;;  %v719_v27 = vrot.slane %v702_v15, %v2894_v16  ;;  %v727_v35 = vrot.slane %v699_v14, %v2894_v16  ;;  %v731_v36 = vrot.slane %v701_v20, %v2894_v16 }
 0x11c   : > { %v735_v37 = vrot.slane %v703_v22, %v2894_v16 }
 0x17e   : > { %v1050_v17 = vpop.f32.mrb[2].mxu1 }
 0x17f   : > { %v2212_v19 = vpop.f32.mrb[3].mxu1  ;;  %v1051_v51 = vadd.f32 %v1983_v38, %v1050_v17 }
 0x182   : > { %v572_v25 = vpop.f32.mrb[0].mxu0  ;;  %v1123_v26 = vpop.f32.mrb[4].mxu1 }
 0x183   : > { %v573_v28 = vadd.f32 %v1972_v21, %v572_v25  ;;  %v1128_v29 = vcombine.high %v1123_v26, %v1123_v26  ;;  %v1135_v30 = vrot.slane %v1123_v26, %v661_v4  ;;  %v2217_v31 = vpop.f32.mrb[5].mxu1  ;;  %v2158_v32 = vpop.f32.mrb[1].mxu0 }
 0x184   : > { %v950_v31 = vld [vmem:[%s2842_s11 + $0x88] sm:$0xff] }
 0x185   : > { %v1142_v39 = vrot.slane %v1128_v29, %v661_v4  ;;  %v1143_v40 = vcombine.high %v1135_v30, %v1135_v30  ;;  %v1151_v41 = vrot.slane %v1135_v30, %v661_v4  ;;  %v744_v42 = vadd.f32 %v707_v23, %v573_v28  ;;  %v949_v30 = vld [vmem:[%s2842_s11 + $0x80] sm:$0xff] }
 0x186   : > { %v745_v43 = vadd.f32 %v711_v24, %v573_v28  ;;  %v746_v44 = vadd.f32 %v715_v33, %v573_v28  ;;  %v747_v45 = vadd.f32 %v719_v27, %v573_v28  ;;  %v748_v46 = vadd.f32 %v723_v34, %v573_v28  ;;  %v951_v34 = vld [vmem:[%s2842_s11 + $0x90] sm:$0xff] }
 0x187   : > { %v1144_v47 = vcombine.high %v1142_v39, %v1142_v39  ;;  %v1158_v48 = vrot.slane %v1142_v39, %v661_v4  ;;  %v1165_v49 = vrot.slane %v1143_v40, %v661_v4  ;;  %v1173_v50 = vcombine.high %v1151_v41, %v1151_v41  ;;  %v953_v40 = vld [vmem:[%s2842_s11 + $0xa0] sm:$0xff] }
 0x188   : > { %v1180_v52 = vrot.slane %v1151_v41, %v2894_v16  ;;  %v752_v53 = vmax.f32 %v744_v42, 0.0  ;;  %v753_v54 = vmax.f32 %v745_v43, 0.0  ;;  %v754_v57 = vmax.f32 %v746_v44, 0.0  ;;  %v954_v41 = vld [vmem:[%s2842_s11 + $0xa8] sm:$0xff]  ;;  %v2007_v42 = vld [vmem:[%s2842_s11 + $0x198] sm:$0xff]  ;;  %v2008_v43 = vld [vmem:[%s2842_s11 + $0x1a0] sm:$0xff] }
 0x189   : > { %v1175_v55 = vcombine.high %v1165_v49, %v1165_v49  ;;  %v1184_v56 = vrot.slane %v1165_v49, %v2894_v16  ;;  %v1172_v58 = vrot.slane %v1144_v47, %v661_v4  ;;  %v1174_v59 = vcombine.high %v1158_v48, %v1158_v48  ;;  %v956_v47 = vld [vmem:[%s2842_s11 + $0xb8] sm:$0xff]  ;;  %v2010_v49 = vld [vmem:[%s2842_s11 + $0x1b0] sm:$0xff] }
 0x18a   : > { %2196 = vmatprep.mubr.f32.mxu0 %v752_v53  ;;  %v1217_v60 = vadd.f32 %v1180_v52, %v1051_v51  ;;  %v1188_v61 = vrot.slane %v1173_v50, %v2894_v16  ;;  %v749_v63 = vadd.f32 %v727_v35, %v573_v28  ;;  %v750_v0 = vadd.f32 %v731_v36, %v573_v28  ;;  %v952_v35 = vld [vmem:[%s2842_s11 + $0x98] sm:$0xff]  ;;  %v2005_v36 = vld [vmem:[%s2842_s11 + $0x188] sm:$0xff]  ;;  %v957_v52 = vld [vmem:[%s2842_s11 + $0xc0] sm:$0xff] }
 0x18b   : > { %2197 = vmatmul.mubr.f32.vlgmr.msra.gmra.mrb[2].mxu0 %v753_v54  ;;  %v1218_v62 = vadd.f32 %v1184_v56, %v1051_v51  ;;  %v1192_v1 = vrot.slane %v1175_v55, %v2894_v16  ;;  %v1196_v7 = vrot.slane %v1158_v48, %v2894_v16  ;;  %v751_v8 = vadd.f32 %v735_v37, %v573_v28  ;;  %v2006_v37 = vld [vmem:[%s2842_s11 + $0x190] sm:$0xff]  ;;  %v2009_v48 = vld [vmem:[%s2842_s11 + $0x1a8] sm:$0xff]  ;;  %v2011_v54 = vld [vmem:[%s2842_s11 + $0x1b8] sm:$0xff] }
 0x18c   : > { %2199 = vmatprep.mubr.f32.mxu0 %v754_v57  ;;  %v1225_v2 = vmax.f32 %v1217_v60, 0.0  ;;  %v1219_v6 = vadd.f32 %v1188_v61, %v1051_v51  ;;  %v755_v9 = vmax.f32 %v747_v45, 0.0  ;;  %v756_v11 = vmax.f32 %v748_v46, 0.0  ;;  %v955_v46 = vld [vmem:[%s2842_s11 + $0xb0] sm:$0xff]  ;;  %v958_v53 = vld [vmem:[%s2842_s11 + $0xc8] sm:$0xff]  ;;  %v2012_v55 = vld [vmem:[%s2842_s11 + $0x1c0] sm:$0xff] }
 0x18d   : > { %v1226_v10 = vmax.f32 %v1218_v62, 0.0  ;;  %v1220_v4 = vadd.f32 %v1192_v1, %v1051_v51  ;;  %v1221_v13 = vadd.f32 %v1196_v7, %v1051_v51  ;;  %v1200_v14 = vrot.slane %v1172_v58, %v2894_v16  ;;  %v2013_v60 = vld [vmem:[%s2842_s11 + $0x1c8] sm:$0xff]  ;;  %v2014_v61 = vld [vmem:[%s2842_s11 + $0x1d0] sm:$0xff] }
 0x18e   : > { %2250 = vmatprep.mubr.f32.mxu1 %v1225_v2  ;;  %v1227_v12 = vmax.f32 %v1219_v6, 0.0  ;;  %v1204_v15 = vrot.slane %v1174_v59, %v2894_v16  ;;  %v1176_v17 = vcombine.high %v1172_v58, %v1172_v58  ;;  %v757_v19 = vmax.f32 %v749_v63, 0.0  ;;  %v959_v58 = vld [vmem:[%s2842_s11 + $0xd0] sm:$0xff]  ;;  %v960_v59 = vld [vmem:[%s2842_s11 + $0xd8] sm:$0xff]  ;;  %v962_v1 = vld [vmem:[%s2842_s11 + $0xe8] sm:$0xff] }
 0x18f   : > { %2200 = vmatmul.mubr.f32.gmra.mrb[4].mxu0 %v755_v9  ;;  %2251 = vmatmul.mubr.f32.vlgmr.msra.gmra.mrb[6].mxu1 %v1226_v10  ;;  %v1222_v18 = vadd.f32 %v1200_v14, %v1051_v51  ;;  %v1228_v20 = vmax.f32 %v1220_v4, 0.0  ;;  %v758_v23 = vmax.f32 %v750_v0, 0.0  ;;  %v1229_v24 = vmax.f32 %v1221_v13, 0.0  ;;  %v961_v0 = vld [vmem:[%s2842_s11 + $0xe0] sm:$0xff]  ;;  %v2015_v2 = vld [vmem:[%s2842_s11 + $0x1d8] sm:$0xff]  ;;  %v963_v9 = vld [vmem:[%s2842_s11 + $0xf0] sm:$0xff] }
 0x190   : > { %2202 = vmatprep.mubr.f32.mxu0 %v756_v11  ;;  %2253 = vmatprep.mubr.f32.mxu1 %v1227_v12  ;;  %v1223_v21 = vadd.f32 %v1204_v15, %v1051_v51  ;;  %v1208_v22 = vrot.slane %v1176_v17, %v2894_v16  ;;  %v759_v26 = vmax.f32 %v751_v8, 0.0  ;;  %v2496_v32 = vpack.c.bf16 %v950_v31, %v949_v30  ;;  %v2016_v6 = vld [vmem:[%s2842_s11 + $0x1e0] sm:$0xff]  ;;  %v964_v10 = vld [vmem:[%s2842_s11 + $0xf8] sm:$0xff]  ;;  %v2017_v4 = vld [vmem:[%s2842_s11 + $0x1e8] sm:$0xff] }
 0x191   : > { %v1230_v27 = vmax.f32 %v1222_v18, 0.0  ;;  %v2628_v33 = vmov 0.0|0.0   ;;  %v2499_v38 = vpack.c.bf16 %v952_v35, %v951_v34  ;;  %v2472_v39 = vpack.c.bf16 %v2006_v37, %v2005_v36  ;;  %v2018_v11 = vld [vmem:[%s2842_s11 + $0x1f0] sm:$0xff]  ;;  %v2019_v14 = vld [vmem:[%s2842_s11 + $0x1f8] sm:$0xff]  ;;  %v2020_v15 = vld [vmem:[%s2842_s11 + $0x200] sm:$0xff] }
 0x192   : > { %v1224_v25 = vadd.f32 %v1208_v22, %v1051_v51  ;;  %v1231_v28 = vmax.f32 %v1223_v21, 0.0  ;;  %2495 = vmatprep.subr.bf16.mxu1 %v2628_v33  ;;  %2471 = vmatprep.subr.bf16.mxu0 %v2628_v33  ;;  %v2502_v44 = vpack.c.bf16 %v954_v41, %v953_v40  ;;  %v2475_v45 = vpack.c.bf16 %v2008_v43, %v2007_v42  ;;  %v2969_v18 = vld [vmem:[%s2842_s11 + $0x105] ss:$0 sm:$0xff] }
 0x193   : > { %2203 = vmatmul.mubr.f32.gmra.mrb[6].mxu0 %v757_v19  ;;  %2254 = vmatmul.mubr.f32.gmra.mrb[8].mxu1 %v1228_v20  ;;  %v2505_v50 = vpack.c.bf16 %v956_v47, %v955_v46  ;;  %v2478_v51 = vpack.c.bf16 %v2010_v49, %v2009_v48  ;;  %v2508_v56 = vpack.c.bf16 %v958_v53, %v957_v52 }
 0x194   : > { %2205 = vmatprep.mubr.f32.mxu0 %v758_v23  ;;  %2256 = vmatprep.mubr.f32.mxu1 %v1229_v24  ;;  %v1232_v29 = vmax.f32 %v1224_v25, 0.0  ;;  %v2481_v57 = vpack.c.bf16 %v2012_v55, %v2011_v54  ;;  %v2511_v62 = vpack.c.bf16 %v960_v59, %v959_v58  ;;  %v2484_v63 = vpack.c.bf16 %v2014_v61, %v2013_v60  ;;  %v2974_v23 = vld [vmem:[%s2842_s11 + $0x20d] ss:$0 sm:$0xff] }
 0x195   : > { %2497 = vmatpush3.bf16.msra.mxu1 %v2496_v32  ;;  %2473 = vmatpush3.bf16.msra.mxu0 %v2472_v39  ;;  %v2514_v7 = vpack.c.bf16 %v962_v1, %v961_v0  ;;  %v2487_v8 = vpack.c.bf16 %v2016_v6, %v2015_v2  ;;  %v2517_v12 = vpack.c.bf16 %v964_v10, %v963_v9 }
 0x196   : > { %2498 = vmatprep.subr.bf16.mxu1 %v2628_v33  ;;  %2474 = vmatprep.subr.bf16.mxu0 %v2628_v33  ;;  %v2490_v13 = vpack.c.bf16 %v2018_v11, %v2017_v4  ;;  %v2493_v17 = vpack.c.bf16 %v2020_v15, %v2019_v14 }
 0x197   : > { %2206 = vmatmul.mubr.f32.gmra.mrb[8].mxu0 %v759_v26  ;;  %2257 = vmatmul.mubr.f32.gmra.mrb[10].mxu1 %v1230_v27 }
 0x198   : > { %2259 = vmatprep.mubr.f32.mxu1 %v1231_v28  ;;  %2294 = vmatprep.mubr.msk.f32.mxu0 %vm2626_vm1, %v2625_v3 }
 0x199   : > { %2500 = vmatpush3.bf16.msra.mxu1 %v2499_v38  ;;  %2476 = vmatpush3.bf16.msra.mxu0 %v2475_v45 }
 0x19a   : > { %2501 = vmatprep.subr.bf16.mxu1 %v2628_v33  ;;  %2477 = vmatprep.subr.bf16.mxu0 %v2628_v33 }
 0x19b   : > { %2260 = vmatmul.mubr.f32.gmra.mrb[12].mxu1 %v1232_v29 }
 0x19c   : > { %2329 = vmatprep.mubr.msk.f32.mxu1 %vm2626_vm1, %v2625_v3 }
 0x19d   : > { %2503 = vmatpush3.bf16.msra.mxu1 %v2502_v44  ;;  %2479 = vmatpush3.bf16.msra.mxu0 %v2478_v51 }
 0x19e   : > { %2504 = vmatprep.subr.bf16.mxu1 %v2628_v33  ;;  %2480 = vmatprep.subr.bf16.mxu0 %v2628_v33 }
 0x1a1   : > { %2506 = vmatpush3.bf16.msra.mxu1 %v2505_v50  ;;  %2482 = vmatpush3.bf16.msra.mxu0 %v2481_v57 }
 0x1a2   : > { %2507 = vmatprep.subr.bf16.mxu1 %v2628_v33  ;;  %2483 = vmatprep.subr.bf16.mxu0 %v2628_v33 }
 0x1a5   : > { %2509 = vmatpush3.bf16.msra.mxu1 %v2508_v56  ;;  %2485 = vmatpush3.bf16.msra.mxu0 %v2484_v63 }
 0x1a6   : > { %2510 = vmatprep.subr.bf16.mxu1 %v2628_v33  ;;  %2486 = vmatprep.subr.bf16.mxu0 %v2628_v33 }
 0x1a9   : > { %2512 = vmatpush3.bf16.msra.mxu1 %v2511_v62  ;;  %2488 = vmatpush3.bf16.msra.mxu0 %v2487_v8 }
 0x1aa   : > { %2513 = vmatprep.subr.bf16.mxu1 %v2628_v33  ;;  %2489 = vmatprep.subr.bf16.mxu0 %v2628_v33 }
 0x1ad   : > { %2515 = vmatpush3.bf16.msra.mxu1 %v2514_v7  ;;  %2491 = vmatpush3.bf16.msra.mxu0 %v2490_v13 }
 0x1ae   : > { %2516 = vmatprep.subr.bf16.mxu1 %v2628_v33  ;;  %2492 = vmatprep.subr.bf16.mxu0 %v2628_v33 }
 0x1b1   : > { %2518 = vmatpush3.bf16.msra.mxu1 %v2517_v12  ;;  %2494 = vmatpush3.bf16.msra.mxu0 %v2493_v17 }
 0x1b2   : > { %2543 = vmatprep.subr.bf16.mxu1 %v2628_v33  ;;  %2332 = vmatprep.subr.mxu0 %v2625_v3 }
 0x25e   : > { %v2198_v19 = vpop.f32.mrb[2].mxu0 }
 0x25f   : > { %v852_v20 = vadd.f32 %v2198_v19, %v2969_v18  ;;  %v846_v21 = vpop.f32.mrb[3].mxu0 }
 0x260   : > { %v847_v22 = vadd.f32 %v2969_v18, %v846_v21 }
 0x261   : > { %v886_v24 = vmax.f32 %v852_v20, 0.0 }
 0x262   : > { %v885_v25 = vmax.f32 %v847_v22, 0.0  ;;  %v2201_v26 = vpop.f32.mrb[4].mxu0  ;;  %v2252_v27 = vpop.f32.mrb[6].mxu1 }
 0x263   : > { %v899_v28 = vrot.slane %v886_v24, 4  ;;  %v862_v29 = vadd.f32 %v2201_v26, %v2969_v18  ;;  %v856_v30 = vpop.f32.mrb[5].mxu0  ;;  %v1325_v31 = vadd.f32 %v2252_v27, %v2974_v23  ;;  %v1319_v32 = vpop.f32.mrb[7].mxu1 }
 0x264   : > { %v893_v34 = vrot.slane %v885_v25, 4  ;;  %v857_v35 = vadd.f32 %v2969_v18, %v856_v30  ;;  %v1320_v36 = vadd.f32 %v2974_v23, %v1319_v32 }
 0x265   : > { %v900_v37 = vadd.f32 %v899_v28, %v886_v24  ;;  %v888_v38 = vmax.f32 %v862_v29, 0.0  ;;  %v1359_v39 = vmax.f32 %v1325_v31, 0.0 }
 0x266   : > { %v894_v40 = vadd.f32 %v893_v34, %v885_v25  ;;  %v887_v41 = vmax.f32 %v857_v35, 0.0  ;;  %v1358_v42 = vmax.f32 %v1320_v36, 0.0  ;;  %v2204_v43 = vpop.f32.mrb[6].mxu0  ;;  %v2255_v44 = vpop.f32.mrb[8].mxu1 }
 0x267   : > { %v901_v45 = vrot.slane %v900_v37, 2  ;;  %v911_v46 = vrot.slane %v888_v38, 4  ;;  %v1372_v47 = vrot.slane %v1359_v39, 4  ;;  %v872_v48 = vadd.f32 %v2204_v43, %v2969_v18  ;;  %v866_v49 = vpop.f32.mrb[7].mxu0  ;;  %v1329_v50 = vpop.f32.mrb[9].mxu1 }
 0x268   : > { %v895_v51 = vrot.slane %v894_v40, 2  ;;  %v905_v52 = vrot.slane %v887_v41, 4  ;;  %v1366_v53 = vrot.slane %v1358_v42, 4  ;;  %v867_v54 = vadd.f32 %v2969_v18, %v866_v49 }
 0x269   : > { %v902_v55 = vadd.f32 %v901_v45, %v900_v37  ;;  %v912_v56 = vadd.f32 %v911_v46, %v888_v38  ;;  %v1373_v57 = vadd.f32 %v1372_v47, %v1359_v39  ;;  %v890_v58 = vmax.f32 %v872_v48, 0.0 }
 0x26a   : > { %v896_v59 = vadd.f32 %v895_v51, %v894_v40  ;;  %v906_v60 = vadd.f32 %v905_v52, %v887_v41  ;;  %v1367_v61 = vadd.f32 %v1366_v53, %v1358_v42  ;;  %v889_v62 = vmax.f32 %v867_v54, 0.0  ;;  %v2207_v63 = vpop.f32.mrb[8].mxu0  ;;  %v2258_v0 = vpop.f32.mrb[10].mxu1 }
 0x26b   : > { %v903_v1 = vrot.slane %v902_v55, 1  ;;  %v913_v2 = vrot.slane %v912_v56, 2  ;;  %v1374_v6 = vrot.slane %v1373_v57, 2  ;;  %v923_v7 = vrot.slane %v890_v58, 4  ;;  %v876_v8 = vpop.f32.mrb[9].mxu0  ;;  %v1339_v9 = vpop.f32.mrb[11].mxu1 }
 0x26c   : > { %v897_v10 = vrot.slane %v896_v59, 1  ;;  %v907_v4 = vrot.slane %v906_v60, 2  ;;  %v1368_v11 = vrot.slane %v1367_v61, 2  ;;  %v917_v12 = vrot.slane %v889_v62, 4 }
 0x26d   : > { %v904_v13 = vadd.f32 %v903_v1, %v902_v55  ;;  %v914_v14 = vadd.f32 %v913_v2, %v912_v56  ;;  %v1375_v15 = vadd.f32 %v1374_v6, %v1373_v57  ;;  %v924_v17 = vadd.f32 %v923_v7, %v890_v58 }
 0x26e   : > { %v898_v19 = vadd.f32 %v897_v10, %v896_v59  ;;  %v908_v20 = vadd.f32 %v907_v4, %v906_v60  ;;  %v1369_v21 = vadd.f32 %v1368_v11, %v1367_v61  ;;  %v918_v22 = vadd.f32 %v917_v12, %v889_v62  ;;  %v2261_v24 = vpop.f32.mrb[12].mxu1 }
 0x26f   : > { %v915_v25 = vrot.slane %v914_v14, 1  ;;  %v1376_v26 = vrot.slane %v1375_v15, 1  ;;  %v925_v27 = vrot.slane %v924_v17, 2  ;;  %v1335_v28 = vadd.f32 %v2255_v44, %v2974_v23  ;;  %v1349_v29 = vpop.f32.mrb[13].mxu1 }
 0x270   : > { %v1539_v30 = vsel %vm1446_vm5, %v904_v13, %v898_v19  ;;  %v909_v31 = vrot.slane %v908_v20, 1  ;;  %v1370_v32 = vrot.slane %v1369_v21, 1  ;;  %v919_v34 = vrot.slane %v918_v22, 2 }
 0x271   : > { %v1377_v35 = vadd.f32 %v1376_v26, %v1375_v15  ;;  %v926_v36 = vadd.f32 %v925_v27, %v924_v17  ;;  %v1361_v37 = vmax.f32 %v1335_v28, 0.0  ;;  %v1330_v41 = vadd.f32 %v2974_v23, %v1329_v50 }
 0x272   : > { %v910_v38 = vadd.f32 %v909_v31, %v908_v20  ;;  %v1371_v39 = vadd.f32 %v1370_v32, %v1369_v21  ;;  %v920_v40 = vadd.f32 %v919_v34, %v918_v22  ;;  %v916_v42 = vadd.f32 %v915_v25, %v914_v14 }
 0x273   : > { %v1384_v43 = vrot.slane %v1361_v37, 4  ;;  %v882_v45 = vadd.f32 %v2207_v63, %v2969_v18  ;;  %v877_v44 = vadd.f32 %v2969_v18, %v876_v8  ;;  %v1360_v49 = vmax.f32 %v1330_v41, 0.0 }
 0x274   : > { %v1540_v46 = vsel %vm1448_vm6, %v910_v38, %v1539_v30  ;;  %v1447_v47 = vsel %vm1446_vm5, %v1377_v35, %v1371_v39  ;;  %v921_v48 = vrot.slane %v920_v40, 1  ;;  %v927_v51 = vrot.slane %v926_v36, 1 }
 0x275   : > { %v1541_v52 = vsel %vm1450_vm7, %v916_v42, %v1540_v46  ;;  %v1385_v53 = vadd.f32 %v1384_v43, %v1361_v37  ;;  %v892_v54 = vmax.f32 %v882_v45, 0.0  ;;  %v1378_v50 = vrot.slane %v1360_v49, 4 }
 0x276   : > { %v922_v55 = vadd.f32 %v921_v48, %v920_v40  ;;  %v891_v56 = vmax.f32 %v877_v44, 0.0  ;;  %v1345_v57 = vadd.f32 %v2258_v0, %v2974_v23  ;;  %v1340_v18 = vadd.f32 %v2974_v23, %v1339_v9 }
 0x277   : > { %v1386_v58 = vrot.slane %v1385_v53, 2  ;;  %v935_v59 = vrot.slane %v892_v54, 4  ;;  %v1355_v60 = vadd.f32 %v2261_v24, %v2974_v23  ;;  %v1379_v62 = vadd.f32 %v1378_v50, %v1360_v49 }
 0x278   : > { %v1542_v61 = vsel %vm1452_vm8, %v922_v55, %v1541_v52  ;;  %v929_v63 = vrot.slane %v891_v56, 4  ;;  %v1363_v1 = vmax.f32 %v1345_v57, 0.0  ;;  %v1362_v7 = vmax.f32 %v1340_v18, 0.0  ;;  %v1617_v18 = vld [vmem:[%s3011_s18 + $0x100] sm:$0x3] }
 0x279   : > { %v1387_v2 = vadd.f32 %v1386_v58, %v1385_v53  ;;  %v936_v6 = vadd.f32 %v935_v59, %v892_v54  ;;  %v1365_v8 = vmax.f32 %v1355_v60, 0.0  ;;  %v1380_v10 = vrot.slane %v1379_v62, 2  ;;  %v1708_v60 = vld [vmem:[%s3011_s18] sm:$0xff] }
 0x27a   : > { %v930_v4 = vadd.f32 %v929_v63, %v891_v56  ;;  %v1396_v0 = vrot.slane %v1363_v1, 4  ;;  %v1350_v11 = vadd.f32 %v2974_v23, %v1349_v29  ;;  %v928_v12 = vadd.f32 %v927_v51, %v926_v36 }
 0x27b   : > { %v937_v9 = vrot.slane %v936_v6, 2  ;;  %v1390_v13 = vrot.slane %v1362_v7, 4  ;;  %v1408_v14 = vrot.slane %v1365_v8, 4  ;;  %v1381_v15 = vadd.f32 %v1380_v10, %v1379_v62 }
 0x27c   : > { %v931_v17 = vrot.slane %v930_v4, 2  ;;  %v1397_v19 = vadd.f32 %v1396_v0, %v1363_v1  ;;  %v1364_v20 = vmax.f32 %v1350_v11, 0.0  ;;  %v1388_v21 = vrot.slane %v1387_v2, 1  ;;  %v1710_v1 = vld [vmem:[%s3011_s18 + $0x10] sm:$0xff]  ;;  %v1715_v0 = vld [vmem:[%s3011_s18 + $0x38] sm:$0xff]  ;;  %v1717_v11 = vld [vmem:[%s3011_s18 + $0x48] sm:$0xff] }
 0x27d   : > { %v938_v22 = vadd.f32 %v937_v9, %v936_v6  ;;  %v1391_v24 = vadd.f32 %v1390_v13, %v1362_v7  ;;  %v1409_v25 = vadd.f32 %v1408_v14, %v1365_v8  ;;  %v1382_v26 = vrot.slane %v1381_v15, 1  ;;  %v1712_v7 = vld [vmem:[%s3011_s18 + $0x20] sm:$0xff]  ;;  %v1713_v8 = vld [vmem:[%s3011_s18 + $0x28] sm:$0xff]  ;;  %v1718_v9 = vld [vmem:[%s3011_s18 + $0x50] sm:$0xff] }
 0x27e   : > { %v932_v27 = vadd.f32 %v931_v17, %v930_v4  ;;  %v1398_v28 = vrot.slane %v1397_v19, 2  ;;  %v1402_v30 = vrot.slane %v1364_v20, 4  ;;  %v1543_v32 = vsel %vm1454_vm9, %v928_v12, %v1542_v61  ;;  %v1709_v61 = vld [vmem:[%s3011_s18 + $0x8] sm:$0xff]  ;;  %v1714_v4 = vld [vmem:[%s3011_s18 + $0x30] sm:$0xff]  ;;  %v1719_v13 = vld [vmem:[%s3011_s18 + $0x58] sm:$0xff] }
 0x27f   : > { %v939_v23 = vrot.slane %v938_v22, 1  ;;  %v1392_v29 = vrot.slane %v1391_v24, 2  ;;  %v1410_v31 = vrot.slane %v1409_v25, 2  ;;  %v1383_v34 = vadd.f32 %v1382_v26, %v1381_v15  ;;  %v1720_v15 = vld [vmem:[%s3011_s18 + $0x60] sm:$0xff]  ;;  %v1721_v17 = vld [vmem:[%s3011_s18 + $0x68] sm:$0xff]  ;;  %v1801_v26 = vld [vmem:[%s3011_s18 + $0x90] sm:$0xff] }
 0x280   : > { %v933_v35 = vrot.slane %v932_v27, 1  ;;  %v1399_v36 = vadd.f32 %v1398_v28, %v1397_v19  ;;  %v1403_v37 = vadd.f32 %v1402_v30, %v1364_v20  ;;  %v1389_v38 = vadd.f32 %v1388_v21, %v1387_v2  ;;  %v1711_v2 = vld [vmem:[%s3011_s18 + $0x18] sm:$0xff]  ;;  %v1722_v20 = vld [vmem:[%s3011_s18 + $0x70] sm:$0xff] }
 0x281   : > { %v1393_v39 = vadd.f32 %v1392_v29, %v1391_v24  ;;  %v1411_v40 = vadd.f32 %v1410_v31, %v1409_v25  ;;  %v1449_v41 = vsel %vm1448_vm6, %v1383_v34, %v1447_v47  ;;  %v940_v44 = vadd.f32 %v939_v23, %v938_v22  ;;  %v1723_v21 = vld [vmem:[%s3011_s18 + $0x78] sm:$0xff]  ;;  %v1799_v24 = vld [vmem:[%s3011_s18 + $0x80] sm:$0xff]  ;;  %v1800_v25 = vld [vmem:[%s3011_s18 + $0x88] sm:$0xff] }
 0x282   : > { %v934_v42 = vadd.f32 %v933_v35, %v932_v27  ;;  %v1400_v43 = vrot.slane %v1399_v36, 1  ;;  %v1404_v45 = vrot.slane %v1403_v37, 2  ;;  %v1451_v48 = vsel %vm1450_vm7, %v1389_v38, %v1449_v41  ;;  %v1802_v28 = vld [vmem:[%s3011_s18 + $0x98] sm:$0xff]  ;;  %v1803_v23 = vld [vmem:[%s3011_s18 + $0xa0] sm:$0xff]  ;;  %v1804_v29 = vld [vmem:[%s3011_s18 + $0xa8] sm:$0xff] }
 0x283   : > { %v1394_v46 = vrot.slane %v1393_v39, 1  ;;  %v1412_v53 = vrot.slane %v1411_v40, 1  ;;  %v2520_v63 = vpack.c.bf16 %v1709_v61, %v1708_v60  ;;  %v2523_v6 = vpack.c.bf16 %v1711_v2, %v1710_v1  ;;  %v1806_v34 = vld [vmem:[%s3011_s18 + $0xb8] sm:$0xff]  ;;  %v2024_v61 = vld [vmem:[%s3011_s18 + $0x103] ss:$0 sm:$0xff] }
 0x284   : > { %v1405_v49 = vadd.f32 %v1404_v45, %v1403_v37  ;;  %v1544_v51 = vsel %vm1456_vm10, %v934_v42, %v1543_v32  ;;  %v1401_v55 = vadd.f32 %v1400_v43, %v1399_v36  ;;  %v2526_v10 = vpack.c.bf16 %v1713_v8, %v1712_v7  ;;  %v1805_v32 = vld [vmem:[%s3011_s18 + $0xb0] sm:$0xff]  ;;  %v1807_v36 = vld [vmem:[%s3011_s18 + $0xc0] sm:$0xff]  ;;  %v1808_v37 = vld [vmem:[%s3011_s18 + $0xc8] sm:$0xff] }
 0x285   : > { %v1395_v52 = vadd.f32 %v1394_v46, %v1393_v39  ;;  %v1545_v54 = vsel %vm1458_vm11, %v940_v44, %v1544_v51  ;;  %v1413_v58 = vadd.f32 %v1412_v53, %v1411_v40  ;;  %v2535_v14 = vpack.c.bf16 %v1719_v13, %v1718_v9  ;;  %v1809_v39 = vld [vmem:[%s3011_s18 + $0xd0] sm:$0xff]  ;;  %v1810_v40 = vld [vmem:[%s3011_s18 + $0xd8] sm:$0xff]  ;;  %v1811_v42 = vld [vmem:[%s3011_s18 + $0xe0] sm:$0xff] }
 0x286   : > { %v1406_v50 = vrot.slane %v1405_v49, 1  ;;  %2330 = vmatmul.mubr.f32.vlgmr.msra.gmra.mrb[14].mxu1 %v1545_v54  ;;  %v2538_v19 = vpack.c.bf16 %v1721_v17, %v1720_v15  ;;  %v2541_v22 = vpack.c.bf16 %v1723_v21, %v1722_v20  ;;  %v2544_v27 = vpack.c.bf16 %v1800_v25, %v1799_v24  ;;  %v1812_v43 = vld [vmem:[%s3011_s18 + $0xe8] sm:$0xff]  ;;  %v2023_v54 = vld [vmem:[%s3011_s18 + $0x102] ss:$0 sm:$0xff] }
 0x287   : > { %v1453_v47 = vsel %vm1452_vm8, %v1395_v52, %v1451_v48  ;;  %2404 = vmatprep.mubr.msk.f32.mxu1 %vm2626_vm1, %v2625_v3  ;;  %v2547_v30 = vpack.c.bf16 %v1802_v28, %v1801_v26  ;;  %v2550_v31 = vpack.c.bf16 %v1804_v29, %v1803_v23  ;;  %v2553_v35 = vpack.c.bf16 %v1806_v34, %v1805_v32  ;;  %v1621_v48 = vld [vmem:[%s3011_s18 + $0x105] sm:$0x1] }
 0x288   : > { %v1407_v56 = vadd.f32 %v1406_v50, %v1405_v49  ;;  %v1455_v57 = vsel %vm1454_vm9, %v1401_v55, %v1453_v47  ;;  %2545 = vmatpush3.bf16.msra.mxu1 %v2544_v27  ;;  %v2556_v38 = vpack.c.bf16 %v1808_v37, %v1807_v36  ;;  %v2559_v41 = vpack.c.bf16 %v1810_v40, %v1809_v39 }
 0x289   : > { %2546 = vmatprep.subr.bf16.mxu1 %v2628_v33  ;;  %v2562_v45 = vpack.c.bf16 %v1812_v43, %v1811_v42  ;;  %v1701_v53 = vmul.f32 8.0, %v1621_v48 }
 0x28a   : > { %v1457_v59 = vsel %vm1456_vm10, %v1407_v56, %v1455_v57 }
 0x28b   : > { %v1459_v62 = vsel %vm1458_vm11, %v1413_v58, %v1457_v59  ;;  %v1705_v47 = vrot.slane %v1701_v53, %v2894_v16  ;;  %v1813_v59 = vld [vmem:[%s3011_s18 + $0xf0] sm:$0xff] }
 0x28c   : > { %2295 = vmatmul.mubr.f32.vlgmr.msra.gmra.mrb[10].mxu0 %v1459_v62  ;;  %2548 = vmatpush3.bf16.msra.mxu1 %v2547_v30 }
 0x28d   : > { %2333 = vmatpush3.msk.msra.mxu0 %vm580_vm0, %v1617_v18  ;;  %2334 = vmatprep.mubr.msk.f32.mxu0 %vm2626_vm1, %v2625_v3  ;;  %v1814_v18 = vld [vmem:[%s3011_s18 + $0xf8] sm:$0xff] }
 0x28e   : > { %2519 = vmatprep.subr.bf16.mxu0 %v2628_v33  ;;  %2549 = vmatprep.subr.bf16.mxu1 %v2628_v33  ;;  %v2565_v60 = vpack.c.bf16 %v1814_v18, %v1813_v59 }
 0x290   : > { %2335 = vmatmul.mubr.msk.f32.vlgmr.msra.gmra.mrb[12].mxu0 %vm576_vm2, %v2838_v5  ;;  %v2529_v5 = vpack.c.bf16 %v1715_v0, %v1714_v4  ;;  %2551 = vmatpush3.bf16.msra.mxu1 %v2550_v31 }
 0x291   : > { %2521 = vmatpush3.bf16.msra.mxu0 %v2520_v63  ;;  %2369 = vmatprep.mubr.msk.f32.mxu0 %vm2626_vm1, %v2625_v3  ;;  %v1716_v3 = vld [vmem:[%s3011_s18 + $0x40] sm:$0xff] }
 0x292   : > { %2522 = vmatprep.subr.bf16.mxu0 %v2628_v33  ;;  %v2532_v12 = vpack.c.bf16 %v1717_v11, %v1716_v3  ;;  %2552 = vmatprep.subr.bf16.mxu1 %v2628_v33 }
 0x294   : > { %2554 = vmatpush3.bf16.msra.mxu1 %v2553_v35 }
 0x295   : > { %2524 = vmatpush3.bf16.msra.mxu0 %v2523_v6  ;;  %2555 = vmatprep.subr.bf16.mxu1 %v2628_v33  ;;  %v2025_v6 = vld [vmem:[%s3011_s18 + $0x104] ss:$0 sm:$0xff] }
 0x296   : > { %2525 = vmatprep.subr.bf16.mxu0 %v2628_v33 }
 0x298   : > { %2557 = vmatpush3.bf16.msra.mxu1 %v2556_v38 }
 0x299   : > { %2527 = vmatpush3.bf16.msra.mxu0 %v2526_v10  ;;  %2558 = vmatprep.subr.bf16.mxu1 %v2628_v33 }
 0x29a   : > { %2528 = vmatprep.subr.bf16.mxu0 %v2628_v33 }
 0x29c   : > { %2560 = vmatpush3.bf16.msra.mxu1 %v2559_v41 }
 0x29d   : > { %2530 = vmatpush3.bf16.msra.mxu0 %v2529_v5  ;;  %2561 = vmatprep.subr.bf16.mxu1 %v2628_v33 }
 0x29e   : > { %2531 = vmatprep.subr.bf16.mxu0 %v2628_v33 }
 0x2a0   : > { %2563 = vmatpush3.bf16.msra.mxu1 %v2562_v45 }
 0x2a1   : > { %2533 = vmatpush3.bf16.msra.mxu0 %v2532_v12  ;;  %2564 = vmatprep.subr.bf16.mxu1 %v2628_v33 }
 0x2a2   : > { %2534 = vmatprep.subr.bf16.mxu0 %v2628_v33 }
 0x2a4   : > { %2566 = vmatpush3.bf16.msra.mxu1 %v2565_v60 }
 0x2a5   : > { %2536 = vmatpush3.bf16.msra.mxu0 %v2535_v14 }
 0x2a6   : > { %2537 = vmatprep.subr.bf16.mxu0 %v2628_v33 }
 0x2a9   : > { %2539 = vmatpush3.bf16.msra.mxu0 %v2538_v19 }
 0x2aa   : > { %2540 = vmatprep.subr.bf16.mxu0 %v2628_v33 }
 0x2ad   : > { %2542 = vmatpush3.bf16.msra.mxu0 %v2541_v22 }
 0x359   : > { %v1613_v44 = vpop.f32.mrb[14].mxu1 }
 0x35a   : > { %v2331_v46 = vpop.f32.mrb[15].mxu1 }
 0x35f   : > { %v1527_v49 = vpop.f32.mrb[10].mxu0 }
 0x360   : > { %v1614_v51 = vadd.f32 %v1613_v44, %v1527_v49  ;;  %v2296_v52 = vpop.f32.mrb[11].mxu0 }
 0x363   : > { %v1691_v55 = vpop.f32.mrb[12].mxu0 }
 0x364   : > { %v1695_v50 = vadd.f32 %v1691_v55, %v1614_v51  ;;  %v2336_v56 = vpop.f32.mrb[13].mxu0 }
 0x366   : > { %v1700_v57 = vadd.f32 %v2023_v54, %v1695_v50 }
 0x368   : > { %v1706_v33 = vadd.f32 %v1705_v47, %v1700_v57 }
 0x36a   : > { %v1707_v58 = vmax.f32 %v1706_v33, 0.0 }
 0x36c   : > { %2370 = vmatmul.mubr.f32.vlgmr.msra.gmra.mrb[14].mxu0 %v1707_v58 }
 0x43f   : > { %v1794_v62 = vpop.f32.mrb[14].mxu0 }
 0x440   : > { %v1795_v63 = vadd.f32 %v2024_v61, %v1794_v62  ;;  %v2371_v1 = vpop.f32.mrb[15].mxu0 }
 0x442   : > { %v1798_v2 = vmax.f32 %v1795_v63, 0.0 }
 0x444   : > { %2405 = vmatmul.mubr.f32.vlgmr.msra.gmra.mrb[16].mxu1 %v1798_v2 }
 0x517   : > { %v1885_v16 = vpop.f32.mrb[16].mxu1 }
 0x518   : > { %v1886_v7 = vadd.f32 %v2025_v6, %v1885_v16  ;;  %v2406_v8 = vpop.f32.mrb[17].mxu1 }
 0x51a   : > { %1889 = vst [vmem:[%s483_s23] sm:$0xff] %v1886_v7 }
 0x51b PF: > { %p10_p9 = scmp.ge.s32.totalorder %s2668_s16, 4   ;;  %s3096_s12 = smov %s2618_s13 }
 0x51c   : > { %s3097_s13 = smov %s2677_s19  ;;  %s3098_s14 = smov %s2668_s16 }
 0x51d   :  { %12 = sbr.rel (!%p10_p9) target bundleno = 2 (0x2), region = 111 }

</bundles_post_ra>
